<compile_context>
chip_gen: v5e
topology: v5e:2x2
jax: 0.10.0
libtpu: 0.0.40
codegen_flags: <defaults>
</compile_context>

<pallas_src>
import functools

import jax
import jax.numpy as jnp
from jax.experimental import pallas as pl
from jax.experimental.pallas import tpu as pltpu

LANE = 128
SUBLANE = 8


def _round_up(n, m):
    return ((n + m - 1) // m) * m


def _pick_tm(batch):
    """Batch-tile rows: one step for small B, >=2 steps (v7x megacore) for
    medium B, 512 rows for large B (fits 16/32 MiB scoped VMEM everywhere)."""
    if batch < 256:
        return _round_up(max(batch, SUBLANE), SUBLANE)
    if batch < 1024:
        return min(512, _round_up((batch + 1) // 2, SUBLANE))
    return 512


def _encoder_kernel(x_ref, eps_ref, w1_ref, b1_ref, w2_ref, b2_ref,
                    w34_ref, b34_ref, z_ref, kl_ref, *, latent_dims, batch, tm):
    """One batch tile: 3 MXU matmuls (bf16 in / f32 acc), ReLU on the VPU,
    exp on the EUP, fused in-kernel masked KL partial."""
    lp = z_ref.shape[-1]                          # lane-padded latent (128-mult)

    x = x_ref[...]                                # (tm, 784) f32/bf16
    h1 = jnp.dot(x.astype(jnp.bfloat16), w1_ref[...],
                 preferred_element_type=jnp.float32)
    h1 = jnp.maximum(h1 + b1_ref[...], 0.0)       # ReLU, f32

    h2 = jnp.dot(h1.astype(jnp.bfloat16), w2_ref[...],
                 preferred_element_type=jnp.float32)
    h2 = jnp.maximum(h2 + b2_ref[...], 0.0)       # ReLU, f32

    # Fused mu / logsigma head: (tm, 256) @ (256, 2*lp)
    h34 = jnp.dot(h2.astype(jnp.bfloat16), w34_ref[...],
                  preferred_element_type=jnp.float32) + b34_ref[...]

    mu = h34[:, :lp]                              # (tm, lp)
    logsigma = h34[:, lp:]                        # (tm, lp)
    sigma = jnp.exp(logsigma)                     # EUP

    z_ref[...] = mu + sigma * eps_ref[...]

    # In-kernel KL partial: sum(sigma^2 + mu^2 - logsigma - 1/2), using
    # logsigma directly (no exp->log round trip).  Padded latent columns
    # (mu=0, logsigma=0 -> +0.5 each) and padded batch rows are masked out.
    col = jax.lax.broadcasted_iota(jnp.int32, (tm, lp), 1)
    row = (jax.lax.broadcasted_iota(jnp.int32, (tm, lp), 0)
           + pl.program_id(0) * tm)
    valid = (col < latent_dims) & (row < batch)
    kl_elem = jnp.where(valid, sigma * sigma + mu * mu - logsigma - 0.5, 0.0)

    # Reduce (tm, lp) contributions to a single lane-dense (8, lp) block per
    # tile with a short unrolled sublane-group sum (tm is a multiple of 8).
    kl_blk = kl_elem[0:SUBLANE, :]
    for g in range(1, tm // SUBLANE):
        kl_blk = kl_blk + kl_elem[g * SUBLANE:(g + 1) * SUBLANE, :]
    kl_ref[...] = kl_blk


def init_params(key, latent_dims):
    """Deterministic synthetic parameters matching the nn.Linear shapes.
    Weights are stored as (in, out) = W_pytorch.T; biases as (out,)."""
    ks = jax.random.split(key, 8)

    def linear(kw, kb, fan_in, fan_out):
        bound = (1.0 / fan_in) ** 0.5
        w = jax.random.uniform(kw, (fan_in, fan_out), jnp.float32, -bound, bound)
        b = jax.random.uniform(kb, (fan_out,), jnp.float32, -bound, bound)
        return w, b

    w1, b1 = linear(ks[0], ks[1], 784, 512)
    w2, b2 = linear(ks[2], ks[3], 512, 256)
    w3, b3 = linear(ks[4], ks[5], 256, latent_dims)
    w4, b4 = linear(ks[6], ks[7], 256, latent_dims)
    return (w1, b1, w2, b2, w3, b3, w4, b4)


def prepare_params(params, latent_dims):
    """Kernel layout: bf16 weights, (1,N) f32 biases, fused+lane-padded head."""
    w1, b1, w2, b2, w3, b3, w4, b4 = params
    lp = _round_up(latent_dims, LANE)
    pad = lp - latent_dims

    w3p = jnp.pad(w3, ((0, 0), (0, pad)))
    w4p = jnp.pad(w4, ((0, 0), (0, pad)))
    b3p = jnp.pad(b3, ((0, pad),))
    b4p = jnp.pad(b4, ((0, pad),))

    w34 = jnp.concatenate([w3p, w4p], axis=1).astype(jnp.bfloat16)   # (256, 2*lp)
    b34 = jnp.concatenate([b3p, b4p], axis=0).reshape(1, 2 * lp)

    return (w1.astype(jnp.bfloat16), b1.reshape(1, -1),
            w2.astype(jnp.bfloat16), b2.reshape(1, -1),
            w34, b34)


def variational_encoder_forward(x, eps, kparams, latent_dims, *, tm=None):
    """x: (B, 1, 28, 28) f32 (or bf16), eps: (B, latent_dims) ~ N(0,1).
    Returns (z: (B, latent_dims) f32, kl: scalar f32)."""
    w1, b1, w2, b2, w34, b34 = kparams
    B = x.shape[0]
    x2 = x.reshape(B, -1)                          # torch.flatten(x, start_dim=1)
    if x2.dtype not in (jnp.bfloat16, jnp.float32):
        x2 = x2.astype(jnp.float32)
    D = x2.shape[1]
    assert D == w1.shape[0]
    lp = w34.shape[1] // 2

    if tm is None:
        tm = _pick_tm(B)
    tm = _round_up(tm, SUBLANE)
    Bp = _round_up(B, tm)
    if Bp != B:                                    # ragged last tile only
        x2 = jnp.pad(x2, ((0, Bp - B), (0, 0)))
    # Lane-dense eps built with one pad (no scatter / extra HBM round trip).
    eps_p = jnp.pad(eps.astype(jnp.float32),
                    ((0, Bp - B), (0, lp - eps.shape[1])))

    n_tiles = Bp // tm
    grid = (n_tiles,)
    row = lambda i: (i, 0)       # batch-tiled operands
    const = lambda i: (0, 0)     # weights/biases stay resident in VMEM

    flops = 2 * Bp * (D * 512 + 512 * 256 + 256 * 2 * lp)
    bytes_accessed = (x2.size * x2.dtype.itemsize + eps_p.size * 4
                      + (w1.size + w2.size + w34.size) * 2
                      + (b1.size + b2.size + b34.size) * 4
                      + Bp * lp * 4 + n_tiles * SUBLANE * lp * 4)

    kernel = functools.partial(_encoder_kernel, latent_dims=latent_dims,
                               batch=B, tm=tm)

    z_p, kl_p = pl.pallas_call(
        kernel,
        out_shape=(jax.ShapeDtypeStruct((Bp, lp), jnp.float32),
                   jax.ShapeDtypeStruct((n_tiles * SUBLANE, lp), jnp.float32)),
        grid=grid,
        in_specs=[
            pl.BlockSpec((tm, D), row),            # x tile
            pl.BlockSpec((tm, lp), row),           # eps tile
            pl.BlockSpec((D, 512), const),         # w1 (bf16)
            pl.BlockSpec((1, 512), const),         # b1
            pl.BlockSpec((512, 256), const),       # w2 (bf16)
            pl.BlockSpec((1, 256), const),         # b2
            pl.BlockSpec((256, 2 * lp), const),    # fused w3|w4 (bf16)
            pl.BlockSpec((1, 2 * lp), const),      # fused b3|b4
        ],
        out_specs=(pl.BlockSpec((tm, lp), row),        # z
                   pl.BlockSpec((SUBLANE, lp), row)),  # per-tile KL partial
        compiler_params=pltpu.CompilerParams(
            dimension_semantics=("parallel",),
            vmem_limit_bytes=32 * 1024 * 1024),
        cost_estimate=pl.CostEstimate(
            flops=flops,
            transcendentals=Bp * lp,
            bytes_accessed=bytes_accessed),
    )(x2, eps_p, w1, b1, w2, b2, w34, b34)

    z = z_p[:B, :latent_dims]
    kl = jnp.sum(kl_p)            # tiny (n_tiles*8, 128) reduce in the wrapper
    return z, kl


def _reference_forward(x, eps, kparams, latent_dims):
    """Pure-JAX reference using the same bf16-weight / f32-accumulate recipe."""
    w1, b1, w2, b2, w34, b34 = kparams
    B = x.shape[0]
    x2 = x.reshape(B, -1).astype(jnp.float32)
    lp = w34.shape[1] // 2

    h1 = jnp.maximum(jnp.dot(x2.astype(jnp.bfloat16), w1,
                             preferred_element_type=jnp.float32) + b1, 0.0)
    h2 = jnp.maximum(jnp.dot(h1.astype(jnp.bfloat16), w2,
                             preferred_element_type=jnp.float32) + b2, 0.0)
    h34 = jnp.dot(h2.astype(jnp.bfloat16), w34,
                  preferred_element_type=jnp.float32) + b34
    mu = h34[:, :latent_dims]
    logsigma = h34[:, lp:lp + latent_dims]
    sigma = jnp.exp(logsigma)
    z = mu + sigma * eps
    kl = jnp.sum(sigma ** 2 + mu ** 2 - logsigma - 0.5)
    return z, kl


if __name__ == "__main__":
    latent_dims = 32
    batch = 16

    key = jax.random.PRNGKey(0)
    kx, ke, kp = jax.random.split(key, 3)
    x = jax.random.normal(kx, (batch, 1, 28, 28), jnp.float32)
    # TODO(synk): torch.distributions.Normal(0,1).sample has no in-kernel torch
    # equivalent; standard-normal noise is generated here and fed as an input
    # (could be moved in-kernel via pltpu.prng_seed/prng_random_bits).
    eps = jax.random.normal(ke, (batch, latent_dims), jnp.float32)

    params = init_params(kp, latent_dims)
    kparams = prepare_params(params, latent_dims)

    z, kl = variational_encoder_forward(x, eps, kparams, latent_dims)
    z = jax.block_until_ready(z)
    kl = jax.block_until_ready(kl)

    z_ref, kl_ref = _reference_forward(x, eps, kparams, latent_dims)
    assert z.shape == (batch, latent_dims)
    assert jnp.allclose(z, z_ref, atol=2e-3, rtol=2e-3)
    assert jnp.allclose(kl, kl_ref, atol=1e-2, rtol=1e-2)

    print("KERNEL_OK")
</pallas_src>

<mosaic_0001>
module attributes {stable_mosaic.version = 11 : i64} {
  func.func @_encoder_kernel(%arg0: i32, %arg1: memref<16x784xf32, #tpu.memory_space<vmem>>, %arg2: memref<16x128xf32, #tpu.memory_space<vmem>>, %arg3: memref<784x512xbf16, #tpu.memory_space<vmem>>, %arg4: memref<1x512xf32, #tpu.memory_space<vmem>>, %arg5: memref<512x256xbf16, #tpu.memory_space<vmem>>, %arg6: memref<1x256xf32, #tpu.memory_space<vmem>>, %arg7: memref<256x256xbf16, #tpu.memory_space<vmem>>, %arg8: memref<1x256xf32, #tpu.memory_space<vmem>>, %arg9: memref<16x128xf32, #tpu.memory_space<vmem>>, %arg10: memref<8x128xf32, #tpu.memory_space<vmem>>) attributes {dimension_semantics = [#tpu.dimension_semantics<parallel>], iteration_bounds = array<i64: 1>, scalar_prefetch = 0 : i64, scratch_operands = 0 : i64, tpu.core_type = #tpu.core_type<tc>, window_params = [{transform_indices = @transform_0, window_bounds = array<i64: 16, 784>}, {transform_indices = @transform_1, window_bounds = array<i64: 16, 128>}, {pipeline_mode = #tpu.pipeline_mode<synchronous>, transform_indices = @transform_2, window_bounds = array<i64: 784, 512>}, {pipeline_mode = #tpu.pipeline_mode<synchronous>, transform_indices = @transform_3, window_bounds = array<i64: 1, 512>}, {pipeline_mode = #tpu.pipeline_mode<synchronous>, transform_indices = @transform_4, window_bounds = array<i64: 512, 256>}, {pipeline_mode = #tpu.pipeline_mode<synchronous>, transform_indices = @transform_5, window_bounds = array<i64: 1, 256>}, {pipeline_mode = #tpu.pipeline_mode<synchronous>, transform_indices = @transform_6, window_bounds = array<i64: 256, 256>}, {pipeline_mode = #tpu.pipeline_mode<synchronous>, transform_indices = @transform_7, window_bounds = array<i64: 1, 256>}, {transform_indices = @transform_8, window_bounds = array<i64: 16, 128>}, {transform_indices = @transform_9, window_bounds = array<i64: 8, 128>}]} {
    %c0 = arith.constant 0 : index
    %c0_0 = arith.constant 0 : index
    %0 = vector.load %arg1[%c0, %c0_0] : memref<16x784xf32, #tpu.memory_space<vmem>>, vector<16x784xf32>
    %1 = arith.truncf %0 : vector<16x784xf32> to vector<16x784xbf16>
    %c0_1 = arith.constant 0 : index
    %c0_2 = arith.constant 0 : index
    %2 = vector.load %arg3[%c0_1, %c0_2] : memref<784x512xbf16, #tpu.memory_space<vmem>>, vector<784x512xbf16>
    %cst = arith.constant dense<0.000000e+00> : vector<16x512xf32>
    %3 = tpu.matmul %1, %2, %cst {dimension_numbers = #tpu.dot_dimension_numbers<[1], [0], [0], [1], [0, 0, 1, 1], [], []>} : vector<16x784xbf16>, vector<784x512xbf16>, vector<16x512xf32> -> vector<16x512xf32>
    %c0_3 = arith.constant 0 : index
    %c0_4 = arith.constant 0 : index
    %4 = vector.load %arg4[%c0_3, %c0_4] : memref<1x512xf32, #tpu.memory_space<vmem>>, vector<1x512xf32>
    %5 = vector.broadcast %4 : vector<1x512xf32> to vector<16x512xf32>
    %6 = arith.addf %3, %5 : vector<16x512xf32>
    %cst_5 = arith.constant 0.000000e+00 : f32
    %7 = vector.broadcast %cst_5 : f32 to vector<16x512xf32>
    %8 = arith.maximumf %6, %7 : vector<16x512xf32>
    %9 = arith.truncf %8 : vector<16x512xf32> to vector<16x512xbf16>
    %c0_6 = arith.constant 0 : index
    %c0_7 = arith.constant 0 : index
    %10 = vector.load %arg5[%c0_6, %c0_7] : memref<512x256xbf16, #tpu.memory_space<vmem>>, vector<512x256xbf16>
    %cst_8 = arith.constant dense<0.000000e+00> : vector<16x256xf32>
    %11 = tpu.matmul %9, %10, %cst_8 {dimension_numbers = #tpu.dot_dimension_numbers<[1], [0], [0], [1], [0, 0, 1, 1], [], []>} : vector<16x512xbf16>, vector<512x256xbf16>, vector<16x256xf32> -> vector<16x256xf32>
    %c0_9 = arith.constant 0 : index
    %c0_10 = arith.constant 0 : index
    %12 = vector.load %arg6[%c0_9, %c0_10] : memref<1x256xf32, #tpu.memory_space<vmem>>, vector<1x256xf32>
    %13 = vector.broadcast %12 : vector<1x256xf32> to vector<16x256xf32>
    %14 = arith.addf %11, %13 : vector<16x256xf32>
    %cst_11 = arith.constant 0.000000e+00 : f32
    %15 = vector.broadcast %cst_11 : f32 to vector<16x256xf32>
    %16 = arith.maximumf %14, %15 : vector<16x256xf32>
    %17 = arith.truncf %16 : vector<16x256xf32> to vector<16x256xbf16>
    %c0_12 = arith.constant 0 : index
    %c0_13 = arith.constant 0 : index
    %18 = vector.load %arg7[%c0_12, %c0_13] : memref<256x256xbf16, #tpu.memory_space<vmem>>, vector<256x256xbf16>
    %cst_14 = arith.constant dense<0.000000e+00> : vector<16x256xf32>
    %19 = tpu.matmul %17, %18, %cst_14 {dimension_numbers = #tpu.dot_dimension_numbers<[1], [0], [0], [1], [0, 0, 1, 1], [], []>} : vector<16x256xbf16>, vector<256x256xbf16>, vector<16x256xf32> -> vector<16x256xf32>
    %c0_15 = arith.constant 0 : index
    %c0_16 = arith.constant 0 : index
    %20 = vector.load %arg8[%c0_15, %c0_16] : memref<1x256xf32, #tpu.memory_space<vmem>>, vector<1x256xf32>
    %21 = vector.broadcast %20 : vector<1x256xf32> to vector<16x256xf32>
    %22 = arith.addf %19, %21 : vector<16x256xf32>
    %23 = vector.extract_strided_slice %22 {offsets = [0, 0], sizes = [16, 128], strides = [1, 1]} : vector<16x256xf32> to vector<16x128xf32>
    %24 = vector.extract_strided_slice %22 {offsets = [0, 128], sizes = [16, 128], strides = [1, 1]} : vector<16x256xf32> to vector<16x128xf32>
    %25 = math.exp %24 : vector<16x128xf32>
    %c0_17 = arith.constant 0 : index
    %c0_18 = arith.constant 0 : index
    %26 = vector.load %arg2[%c0_17, %c0_18] : memref<16x128xf32, #tpu.memory_space<vmem>>, vector<16x128xf32>
    %27 = arith.mulf %25, %26 : vector<16x128xf32>
    %28 = arith.addf %23, %27 : vector<16x128xf32>
    %c0_19 = arith.constant 0 : index
    %c0_20 = arith.constant 0 : index
    %29 = vector.load %arg9[%c0_19, %c0_20] : memref<16x128xf32, #tpu.memory_space<vmem>>, vector<16x128xf32>
    tpu.vector_store %arg9[%c0_19, %c0_20], %28 {strides = array<i32>} : memref<16x128xf32, #tpu.memory_space<vmem>>, vector<16x128xf32>,
    %30 = tpu.iota {dimensions = array<i32: 1>} : vector<16x128xi32>
    %31 = tpu.iota {dimensions = array<i32: 0>} : vector<16x128xi32>
    %c16_i32 = arith.constant 16 : i32
    %32 = arith.muli %arg0, %c16_i32 : i32
    %33 = vector.broadcast %32 : i32 to vector<16x128xi32>
    %34 = arith.addi %31, %33 : vector<16x128xi32>
    %c32_i32 = arith.constant 32 : i32
    %35 = vector.broadcast %c32_i32 : i32 to vector<16x128xi32>
    %36 = arith.cmpi slt, %30, %35 : vector<16x128xi32>
    %c16_i32_21 = arith.constant 16 : i32
    %37 = vector.broadcast %c16_i32_21 : i32 to vector<16x128xi32>
    %38 = arith.cmpi slt, %34, %37 : vector<16x128xi32>
    %39 = arith.andi %36, %38 : vector<16x128xi1>
    %40 = arith.mulf %25, %25 : vector<16x128xf32>
    %41 = arith.mulf %23, %23 : vector<16x128xf32>
    %42 = arith.addf %40, %41 : vector<16x128xf32>
    %43 = arith.subf %42, %24 : vector<16x128xf32>
    %cst_22 = arith.constant 5.000000e-01 : f32
    %44 = vector.broadcast %cst_22 : f32 to vector<16x128xf32>
    %45 = arith.subf %43, %44 : vector<16x128xf32>
    %cst_23 = arith.constant 0.000000e+00 : f32
    %46 = vector.broadcast %cst_23 : f32 to vector<16x128xf32>
    %47 = arith.select %39, %45, %46 : vector<16x128xi1>, vector<16x128xf32>
    %48 = vector.extract_strided_slice %47 {offsets = [0, 0], sizes = [8, 128], strides = [1, 1]} : vector<16x128xf32> to vector<8x128xf32>
    %49 = vector.extract_strided_slice %47 {offsets = [8, 0], sizes = [8, 128], strides = [1, 1]} : vector<16x128xf32> to vector<8x128xf32>
    %50 = arith.addf %48, %49 : vector<8x128xf32>
    %c0_24 = arith.constant 0 : index
    %c0_25 = arith.constant 0 : index
    %51 = vector.load %arg10[%c0_24, %c0_25] : memref<8x128xf32, #tpu.memory_space<vmem>>, vector<8x128xf32>
    tpu.vector_store %arg10[%c0_24, %c0_25], %50 {strides = array<i32>} : memref<8x128xf32, #tpu.memory_space<vmem>>, vector<8x128xf32>,
    return
  }
  func.func @transform_0(%arg0: i32) -> (i32, i32) {
    %c0_i32 = arith.constant 0 : i32
    %c0_i32_0 = arith.constant 0 : i32
    return %arg0, %c0_i32 : i32, i32
  }
  func.func @transform_1(%arg0: i32) -> (i32, i32) {
    %c0_i32 = arith.constant 0 : i32
    %c0_i32_0 = arith.constant 0 : i32
    return %arg0, %c0_i32 : i32, i32
  }
  func.func @transform_2(%arg0: i32) -> (i32, i32) {
    %c0_i32 = arith.constant 0 : i32
    %c0_i32_0 = arith.constant 0 : i32
    %c0_i32_1 = arith.constant 0 : i32
    return %c0_i32, %c0_i32_0 : i32, i32
  }
  func.func @transform_3(%arg0: i32) -> (i32, i32) {
    %c0_i32 = arith.constant 0 : i32
    %c0_i32_0 = arith.constant 0 : i32
    %c0_i32_1 = arith.constant 0 : i32
    return %c0_i32, %c0_i32_0 : i32, i32
  }
  func.func @transform_4(%arg0: i32) -> (i32, i32) {
    %c0_i32 = arith.constant 0 : i32
    %c0_i32_0 = arith.constant 0 : i32
    %c0_i32_1 = arith.constant 0 : i32
    return %c0_i32, %c0_i32_0 : i32, i32
  }
  func.func @transform_5(%arg0: i32) -> (i32, i32) {
    %c0_i32 = arith.constant 0 : i32
    %c0_i32_0 = arith.constant 0 : i32
    %c0_i32_1 = arith.constant 0 : i32
    return %c0_i32, %c0_i32_0 : i32, i32
  }
  func.func @transform_6(%arg0: i32) -> (i32, i32) {
    %c0_i32 = arith.constant 0 : i32
    %c0_i32_0 = arith.constant 0 : i32
    %c0_i32_1 = arith.constant 0 : i32
    return %c0_i32, %c0_i32_0 : i32, i32
  }
  func.func @transform_7(%arg0: i32) -> (i32, i32) {
    %c0_i32 = arith.constant 0 : i32
    %c0_i32_0 = arith.constant 0 : i32
    %c0_i32_1 = arith.constant 0 : i32
    return %c0_i32, %c0_i32_0 : i32, i32
  }
  func.func @transform_8(%arg0: i32) -> (i32, i32) {
    %c0_i32 = arith.constant 0 : i32
    %c0_i32_0 = arith.constant 0 : i32
    return %arg0, %c0_i32 : i32, i32
  }
  func.func @transform_9(%arg0: i32) -> (i32, i32) {
    %c0_i32 = arith.constant 0 : i32
    %c0_i32_0 = arith.constant 0 : i32
    return %arg0, %c0_i32 : i32, i32
  }
}

</mosaic_0001>

<bundles_post_ra>
// kernel: tpu_custom_call.1
= control target key start
LH: loop header
LB: loop body
LE: loop exit
PB: predicated region body
PF: predicated region fallthrough
CT: control target
= control target key end

     0   :  { %15 = vsyncpa [#allocation3], 0  ;;  %s4440_s0 = inlined_call_operand.hbm [shape: f32[16,784], index: 0, kind: input, shape index: {}]   ;;  %s4441_s1 = inlined_call_operand.hbm [shape: f32[16,128], index: 1, kind: input, shape index: {}]   ;;  %s4442_s2 = inlined_call_operand.hbm [shape: bf16[784,512], index: 2, kind: input, shape index: {}]   ;;  %s4443_s3 = inlined_call_operand.hbm [shape: f32[1,512], index: 3, kind: input, shape index: {}]   ;;  %s4444_s4 = inlined_call_operand.hbm [shape: bf16[512,256], index: 4, kind: input, shape index: {}]   ;;  %s4445_s5 = inlined_call_operand.vmem [shape: f32[1,256], index: 5, kind: input, shape index: {}]   ;;  %s4446_s6 = inlined_call_operand.hbm [shape: bf16[256,256], index: 6, kind: input, shape index: {}]   ;;  %s4447_s7 = inlined_call_operand.vmem [shape: f32[1,256], index: 7, kind: input, shape index: {}]   ;;  %s4448_s8 = inlined_call_operand.hbm [shape: f32[16,128], index: 8, kind: output, shape index: {0}]   ;;  %s4449_s9 = inlined_call_operand.hbm [shape: f32[8,128], index: 9, kind: output, shape index: {1}]  }
   0x1   :  { %16 = vsyncpa [#allocation6], 0 }
   0x2   :  { %17 = vsyncpa [#allocation9], 0 }
   0x3   :  { %18 = vsyncpa [#allocation12], 0 }
   0x4   :  { %19 = vsyncpa [#allocation4], 0  ;;  %s38_s11 = sshll.u32 %s4441_s1, 4  ;;  %s39_s11 = int_to_ptr.hbm [resolvable:$true] %s38_s11 }
   0x5   :  { %20 = vsyncpa [#allocation15], 0  ;;  %s4269_s12 = smov [#allocation5]   ;;  %s65_s16 = sshll.u32 %s4443_s3, 4  ;;  %s66_s16 = int_to_ptr.hbm [resolvable:$true] %s65_s16 }
   0x6   :  { %s40_s13 = sshll.u32 %s4269_s12, 4  ;;  %s4270_s17 = smov 128   ;;  %s41_s13 = int_to_ptr.vmem [resolvable:$true] %s40_s13 }
   0x7   :  { %s4271_s18 = smov 8   ;;  %s4272_s19 = smov [#allocation8]  }
   0x8   :  { %46 = dma.hbm_to_vmem [thread:$0]  %s39_s11, 256, %s41_s13, [#allocation6], %s4270_s17, %s4270_s17, %s4271_s18  }
   0x9   :  { %s67_s20 = sshll.u32 %s4272_s19, 4  ;;  %s25_s22 = sshll.u32 %s4440_s0, 4  ;;  %s68_s20 = int_to_ptr.vmem [resolvable:$true] %s67_s20  ;;  %s26_s22 = int_to_ptr.hbm [resolvable:$true] %s25_s22 }
   0xa   :  { %70 = dma.hbm_to_vmem [thread:$0]  %s66_s16, 64, %s68_s20, [#allocation9]  }
   0xb   :  { %s4273_s23 = smov [#allocation2]   ;;  %s51_s26 = sshll.u32 %s4442_s2, 4  ;;  %s52_s26 = int_to_ptr.hbm [resolvable:$true] %s51_s26 }
   0xc   :  { %s27_s24 = sshll.u32 %s4273_s23, 4  ;;  %s4274_s27 = smov 896   ;;  %s28_s24 = int_to_ptr.vmem [resolvable:$true] %s27_s24 }
   0xd   :  { %s4275_s28 = smov 56   ;;  %s4276_s29 = smov [#allocation7]  }
   0xe   :  { %33 = dma.hbm_to_vmem [thread:$0]  %s26_s22, 1792, %s28_s24, [#allocation3], %s4274_s27, %s4274_s27, %s4275_s28  }
   0xf   :  { %s53_s30 = sshll.u32 %s4276_s29, 4  ;;  %s4277_s10 = smov 256   ;;  %s54_s30 = int_to_ptr.vmem [resolvable:$true] %s53_s30 }
  0x10   :  { %s4278_s11 = smov 16   ;;  %s75_s13 = sshll.u32 %s4444_s4, 4  ;;  %s76_s13 = int_to_ptr.hbm [resolvable:$true] %s75_s13 }
  0x11   :  { %59 = dma.hbm_to_vmem [thread:$0]  %s52_s26, 25088, %s54_s30, [#allocation6], %s4277_s10, %s4277_s10, %s4278_s11  }
  0x12   :  { %s4279_s14 = smov [#allocation10]   ;;  %s90_s19 = sshll.u32 %s4446_s6, 4  ;;  %s91_s19 = int_to_ptr.hbm [resolvable:$true] %s90_s19 }
  0x13   :  { %s77_s15 = sshll.u32 %s4279_s14, 4  ;;  %s4280_s20 = smov [#allocation11]   ;;  %s78_s15 = int_to_ptr.vmem [resolvable:$true] %s77_s15 }
  0x14   :  { %83 = dma.hbm_to_vmem [thread:$0]  %s76_s13, 8192, %s78_s15, [#allocation9], %s4270_s17, %s4270_s17, %s4271_s18  }
  0x15   :  { %s92_s21 = sshll.u32 %s4280_s20, 4  ;;  %s93_s21 = int_to_ptr.vmem [resolvable:$true] %s92_s21 }
  0x16   :  { %98 = dma.hbm_to_vmem [thread:$0]  %s91_s19, 4096, %s93_s21, [#allocation12], %s4270_s17, %s4270_s17, %s4271_s18  }
  0x17   :  { %4257 = dma.done.wait [#allocation3], 1792  }
  0x18   :  { %4258 = vsyncadd [#allocation3], 4294965504 }
  0x19   :  { %4259 = dma.done.wait [#allocation6], 25344  }
  0x1a   :  { %4260 = vsyncadd [#allocation6], 4294941952 }
  0x1b   :  { %4261 = dma.done.wait [#allocation9], 8256  }
  0x1c   :  { %4262 = vsyncadd [#allocation9], 4294959040 }
  0x1d   :  { %4263 = dma.done.wait [#allocation12], 4096  }
  0x1e   :  { %4264 = vsyncadd [#allocation12], 4294963200  ;;  %v2695_v0 = vld [vmem:[#allocation7 + $0xe0] sm:$0xf]  ;;  %v3785_v1 = vld [vmem:[#allocation7 + $0xec] sm:$0xf0] }
  0x1f   :  { %v2823_v2 = vld [vmem:[#allocation7 + $0x1e0] sm:$0xf]  ;;  %v2696_v3 = vor.u32 %v3785_v1, %v2695_v0  ;;  %v3817_v4 = vld [vmem:[#allocation7 + $0x1ec] sm:$0xf0]  ;;  %vm1333_vm0 = vcmask 130048   ;;  %s2549_s3 = sshll.u32 %s4448_s8, 4  ;;  %s2550_s3 = int_to_ptr.hbm [resolvable:$true] %s2549_s3 }
  0x20   :  { %v2951_v5 = vld [vmem:[#allocation7 + $0x2e0] sm:$0xf]  ;;  %v3849_v6 = vld [vmem:[#allocation7 + $0x2ec] sm:$0xf0]  ;;  %v2824_v7 = vor.u32 %v3817_v4, %v2823_v2  ;;  %s4282_s25 = smov [#allocation14]   ;;  %s2563_s28 = sshll.u32 %s4449_s9, 4  ;;  %s2564_s28 = int_to_ptr.hbm [resolvable:$true] %s2563_s28 }
  0x21   :  { %v2952_v8 = vor.u32 %v3849_v6, %v2951_v5  ;;  %v3079_v9 = vld [vmem:[#allocation7 + $0x3e0] sm:$0xf]  ;;  %v3881_v10 = vld [vmem:[#allocation7 + $0x3ec] sm:$0xf0]  ;;  %1337 = vmatpush.bf16.msra.mxu0 %v2696_v3  ;;  %s2561_s8 = sshll.u32 %s4282_s25, 4  ;;  %s2562_s8 = int_to_ptr.vmem [resolvable:$true] %s2561_s8 }
  0x22   :  { %v2679_v11 = vld [vmem:[#allocation7 + $0xc0] sm:$0xf]  ;;  %v3080_v12 = vor.u32 %v3881_v10, %v3079_v9  ;;  %v3781_v13 = vld [vmem:[#allocation7 + $0xcc] sm:$0xf0]  ;;  %1351 = vmatpush.bf16.msra.mxu1 %v2824_v7 }
  0x23   :  { %v2807_v14 = vld [vmem:[#allocation7 + $0x1c0] sm:$0xf]  ;;  %v3813_v15 = vld [vmem:[#allocation7 + $0x1cc] sm:$0xf0]  ;;  %1365 = vmatpush.bf16.msra.mxu2 %v2952_v8  ;;  %v2680_v16 = vor.u32 %v3781_v13, %v2679_v11 }
  0x24   :  { %v2808_v17 = vor.u32 %v3813_v15, %v2807_v14  ;;  %v2935_v18 = vld [vmem:[#allocation7 + $0x2c0] sm:$0xf]  ;;  %v3845_v19 = vld [vmem:[#allocation7 + $0x2cc] sm:$0xf0]  ;;  %1379 = vmatpush.bf16.msra.mxu3 %v3080_v12 }
  0x25   :  { %v3063_v20 = vld [vmem:[#allocation7 + $0x3c0] sm:$0xf]  ;;  %v2936_v21 = vor.u32 %v3845_v19, %v2935_v18  ;;  %v3877_v22 = vld [vmem:[#allocation7 + $0x3cc] sm:$0xf0]  ;;  %1338 = vmatpush.bf16.msra.mxu0 %v2680_v16 }
  0x26   :  { %v2663_v23 = vld [vmem:[#allocation7 + $0xa0] sm:$0xf]  ;;  %v3777_v24 = vld [vmem:[#allocation7 + $0xac] sm:$0xf0]  ;;  %v3064_v25 = vor.u32 %v3877_v22, %v3063_v20  ;;  %1352 = vmatpush.bf16.msra.mxu1 %v2808_v17 }
  0x27   :  { %v2791_v26 = vld [vmem:[#allocation7 + $0x1a0] sm:$0xf]  ;;  %v3809_v27 = vld [vmem:[#allocation7 + $0x1ac] sm:$0xf0]  ;;  %v2664_v29 = vor.u32 %v3777_v24, %v2663_v23  ;;  %1366 = vmatpush.bf16.msra.mxu2 %v2936_v21 }
  0x28   :  { %v2919_v28 = vld [vmem:[#allocation7 + $0x2a0] sm:$0xf]  ;;  %v3841_v30 = vld [vmem:[#allocation7 + $0x2ac] sm:$0xf0]  ;;  %v2792_v33 = vor.u32 %v3809_v27, %v2791_v26  ;;  %1380 = vmatpush.bf16.msra.mxu3 %v3064_v25 }
  0x29   :  { %v3047_v31 = vld [vmem:[#allocation7 + $0x3a0] sm:$0xf]  ;;  %v3873_v32 = vld [vmem:[#allocation7 + $0x3ac] sm:$0xf0]  ;;  %v2920_v34 = vor.u32 %v3841_v30, %v2919_v28  ;;  %1339 = vmatpush.bf16.msra.mxu0 %v2664_v29 }
  0x2a   :  { %v2647_v35 = vld [vmem:[#allocation7 + $0x80] sm:$0xf]  ;;  %v3773_v36 = vld [vmem:[#allocation7 + $0x8c] sm:$0xf0]  ;;  %v3048_v38 = vor.u32 %v3873_v32, %v3047_v31  ;;  %1353 = vmatpush.bf16.msra.mxu1 %v2792_v33  ;;  %v3783_v32 = vld [vmem:[#allocation7 + $0xe4] sm:$0xf] }
  0x2b   :  { %v2775_v37 = vld [vmem:[#allocation7 + $0x180] sm:$0xf]  ;;  %v3805_v39 = vld [vmem:[#allocation7 + $0x18c] sm:$0xf0]  ;;  %v2648_v44 = vor.u32 %v3773_v36, %v2647_v35  ;;  %1367 = vmatpush.bf16.msra.mxu2 %v2920_v34  ;;  %v2697_v33 = vld [vmem:[#allocation7 + $0xf0] sm:$0xf0] }
  0x2c   :  { %v2903_v40 = vld [vmem:[#allocation7 + $0x280] sm:$0xf]  ;;  %v3837_v41 = vld [vmem:[#allocation7 + $0x28c] sm:$0xf0]  ;;  %v2776_v45 = vor.u32 %v3805_v39, %v2775_v37  ;;  %1381 = vmatpush.bf16.msra.mxu3 %v3048_v38  ;;  %v135_v36 = vld [vmem:[#allocation2 + $0x48] sm:$0xff] }
  0x2d   :  { %v3031_v42 = vld [vmem:[#allocation7 + $0x380] sm:$0xf]  ;;  %v3869_v43 = vld [vmem:[#allocation7 + $0x38c] sm:$0xf0]  ;;  %v2904_v46 = vor.u32 %v3837_v41, %v2903_v40  ;;  %1340 = vmatpush.bf16.msra.mxu0 %v2648_v44  ;;  %v3815_v41 = vld [vmem:[#allocation7 + $0x1e4] sm:$0xf] }
  0x2e   :  { %v2631_v47 = vld [vmem:[#allocation7 + $0x60] sm:$0xf]  ;;  %v3769_v48 = vld [vmem:[#allocation7 + $0x6c] sm:$0xf0]  ;;  %v3032_v50 = vor.u32 %v3869_v43, %v3031_v42  ;;  %1354 = vmatpush.bf16.msra.mxu1 %v2776_v45  ;;  %v133_v43 = vld [vmem:[#allocation2 + $0x38] sm:$0xff] }
  0x2f   :  { %v2759_v49 = vld [vmem:[#allocation7 + $0x160] sm:$0xf]  ;;  %v3801_v51 = vld [vmem:[#allocation7 + $0x16c] sm:$0xf0]  ;;  %v2632_v56 = vor.u32 %v3769_v48, %v2631_v47  ;;  %1368 = vmatpush.bf16.msra.mxu2 %v2904_v46  ;;  %v2825_v46 = vld [vmem:[#allocation7 + $0x1f0] sm:$0xf0] }
  0x30   :  { %v2887_v52 = vld [vmem:[#allocation7 + $0x260] sm:$0xf]  ;;  %v3833_v53 = vld [vmem:[#allocation7 + $0x26c] sm:$0xf0]  ;;  %v2760_v57 = vor.u32 %v3801_v51, %v2759_v49  ;;  %1382 = vmatpush.bf16.msra.mxu3 %v3032_v50  ;;  %v129_v47 = vld [vmem:[#allocation2 + $0x18] sm:$0xff]  ;;  %v2700_v50 = vor.u32 %v3783_v32, %v2697_v33 }
  0x31   :  { %v3015_v54 = vld [vmem:[#allocation7 + $0x360] sm:$0xf]  ;;  %v3865_v55 = vld [vmem:[#allocation7 + $0x36c] sm:$0xf0]  ;;  %v2888_v58 = vor.u32 %v3833_v53, %v2887_v52  ;;  %1341 = vmatpush.bf16.msra.mxu0 %v2632_v56 }
  0x32   :  { %v2615_v59 = vld [vmem:[#allocation7 + $0x40] sm:$0xf]  ;;  %v3765_v60 = vld [vmem:[#allocation7 + $0x4c] sm:$0xf0]  ;;  %v3016_v62 = vor.u32 %v3865_v55, %v3015_v54  ;;  %1355 = vmatpush.bf16.msra.mxu1 %v2760_v57  ;;  %v3779_v57 = vld [vmem:[#allocation7 + $0xc4] sm:$0xf] }
  0x33   :  { %v2743_v61 = vld [vmem:[#allocation7 + $0x140] sm:$0xf]  ;;  %v3797_v63 = vld [vmem:[#allocation7 + $0x14c] sm:$0xf0]  ;;  %v2616_v4 = vor.u32 %v3765_v60, %v2615_v59  ;;  %1369 = vmatpush.bf16.msra.mxu2 %v2888_v58  ;;  %v2681_v58 = vld [vmem:[#allocation7 + $0xd0] sm:$0xf0] }
  0x34   :  { %v2871_v0 = vld [vmem:[#allocation7 + $0x240] sm:$0xf]  ;;  %v3829_v1 = vld [vmem:[#allocation7 + $0x24c] sm:$0xf0]  ;;  %v2744_v6 = vor.u32 %v3797_v63, %v2743_v61  ;;  %1383 = vmatpush.bf16.msra.mxu3 %v3016_v62  ;;  %v127_v61 = vld [vmem:[#allocation2 + $0x8] sm:$0xff]  ;;  %v2828_v63 = vor.u32 %v3815_v41, %v2825_v46 }
  0x35   :  { %v2999_v2 = vld [vmem:[#allocation7 + $0x340] sm:$0xf]  ;;  %v3861_v3 = vld [vmem:[#allocation7 + $0x34c] sm:$0xf0]  ;;  %v2872_v7 = vor.u32 %v3829_v1, %v2871_v0  ;;  %1342 = vmatpush.bf16.msra.mxu0 %v2616_v4  ;;  %v3811_v1 = vld [vmem:[#allocation7 + $0x1c4] sm:$0xf]  ;;  %v2684_v4 = vor.u32 %v3779_v57, %v2681_v58 }
  0x36   :  { %v2599_v5 = vld [vmem:[#allocation7 + $0x20] sm:$0xf]  ;;  %v3761_v8 = vld [vmem:[#allocation7 + $0x2c] sm:$0xf0]  ;;  %v3000_v11 = vor.u32 %v3861_v3, %v2999_v2  ;;  %1356 = vmatpush.bf16.msra.mxu1 %v2744_v6  ;;  %v2809_v2 = vld [vmem:[#allocation7 + $0x1d0] sm:$0xf0] }
  0x37   :  { %v2727_v9 = vld [vmem:[#allocation7 + $0x120] sm:$0xf]  ;;  %v3793_v10 = vld [vmem:[#allocation7 + $0x12c] sm:$0xf0]  ;;  %v2600_v18 = vor.u32 %v3761_v8, %v2599_v5  ;;  %1370 = vmatpush.bf16.msra.mxu2 %v2872_v7  ;;  %v2761_v41 = vld [vmem:[#allocation7 + $0x170] sm:$0xf0] }
  0x38   :  { %v2855_v12 = vld [vmem:[#allocation7 + $0x220] sm:$0xf]  ;;  %v3825_v13 = vld [vmem:[#allocation7 + $0x22c] sm:$0xf0]  ;;  %v2728_v23 = vor.u32 %v3793_v10, %v2727_v9  ;;  %1384 = vmatpush.bf16.msra.mxu3 %v3000_v11  ;;  %v3775_v10 = vld [vmem:[#allocation7 + $0xa4] sm:$0xf] }
  0x39   :  { %v2983_v14 = vld [vmem:[#allocation7 + $0x320] sm:$0xf]  ;;  %v3857_v15 = vld [vmem:[#allocation7 + $0x32c] sm:$0xf0]  ;;  %v2856_v24 = vor.u32 %v3825_v13, %v2855_v12  ;;  %1343 = vmatpush.bf16.msra.mxu0 %v2600_v18  ;;  %v2665_v11 = vld [vmem:[#allocation7 + $0xb0] sm:$0xf0]  ;;  %v2812_v12 = vor.u32 %v3811_v1, %v2809_v2 }
  0x3a   :  { %v2583_v16 = vld [vmem:[#allocation7] sm:$0xf]  ;;  %v3757_v17 = vld [vmem:[#allocation7 + $0xc] sm:$0xf0]  ;;  %v2984_v28 = vor.u32 %v3857_v15, %v2983_v14  ;;  %1357 = vmatpush.bf16.msra.mxu1 %v2728_v23  ;;  %v3807_v14 = vld [vmem:[#allocation7 + $0x1a4] sm:$0xf] }
  0x3b   :  { %v2711_v19 = vld [vmem:[#allocation7 + $0x100] sm:$0xf]  ;;  %v3789_v20 = vld [vmem:[#allocation7 + $0x10c] sm:$0xf0]  ;;  %v2584_v35 = vor.u32 %v3757_v17, %v2583_v16  ;;  %1371 = vmatpush.bf16.msra.mxu2 %v2856_v24  ;;  %v2793_v15 = vld [vmem:[#allocation7 + $0x1b0] sm:$0xf0]  ;;  %v2668_v17 = vor.u32 %v3775_v10, %v2665_v11 }
  0x3c   :  { %v2839_v21 = vld [vmem:[#allocation7 + $0x200] sm:$0xf]  ;;  %v3821_v22 = vld [vmem:[#allocation7 + $0x20c] sm:$0xf0]  ;;  %v2712_v39 = vor.u32 %v3789_v20, %v2711_v19  ;;  %1385 = vmatpush.bf16.msra.mxu3 %v2984_v28  ;;  %v2649_v23 = vld [vmem:[#allocation7 + $0x90] sm:$0xf0]  ;;  %v2796_v24 = vor.u32 %v3807_v14, %v2793_v15 }
  0x3d   :  { %v2967_v25 = vld [vmem:[#allocation7 + $0x300] sm:$0xf]  ;;  %v3853_v26 = vld [vmem:[#allocation7 + $0x30c] sm:$0xf0]  ;;  %v2840_v40 = vor.u32 %v3821_v22, %v2839_v21  ;;  %1344 = vmatpush.bf16.msra.mxu0 %v2584_v35  ;;  %v3771_v22 = vld [vmem:[#allocation7 + $0x84] sm:$0xf] }
  0x3e   :  { %v3207_v27 = vld [vmem:[#allocation7 + $0x4e0] sm:$0xf]  ;;  %v3913_v29 = vld [vmem:[#allocation7 + $0x4ec] sm:$0xf0]  ;;  %v2968_v44 = vor.u32 %v3853_v26, %v2967_v25  ;;  %1358 = vmatpush.bf16.msra.mxu1 %v2712_v39  ;;  %v3803_v26 = vld [vmem:[#allocation7 + $0x184] sm:$0xf] }
  0x3f   :  { %v3335_v30 = vld [vmem:[#allocation7 + $0x5e0] sm:$0xf]  ;;  %v3945_v31 = vld [vmem:[#allocation7 + $0x5ec] sm:$0xf0]  ;;  %v3208_v45 = vor.u32 %v3913_v29, %v3207_v27  ;;  %1372 = vmatpush.bf16.msra.mxu2 %v2840_v40  ;;  %v2777_v27 = vld [vmem:[#allocation7 + $0x190] sm:$0xf0]  ;;  %v2652_v29 = vor.u32 %v3771_v22, %v2649_v23 }
  0x40   :  { %v128_v34 = vld [vmem:[#allocation2 + $0x10] sm:$0xff]  ;;  %v3351_v37 = vld [vmem:[#allocation7 + $0x600] sm:$0xf]  ;;  %v3336_v49 = vor.u32 %v3945_v31, %v3335_v30  ;;  %1386 = vmatpush.bf16.msra.mxu3 %v2968_v44  ;;  %v3799_v40 = vld [vmem:[#allocation7 + $0x164] sm:$0xf] }
  0x41   :  { %v3949_v38 = vld [vmem:[#allocation7 + $0x60c] sm:$0xf0]  ;;  %v126_v42 = vld [vmem:[#allocation2] sm:$0xff]  ;;  %v4360_v54 = vpack.c.bf16 %v135_v36, %v128_v34  ;;  %1393 = vmatpush.bf16.msrb.mxu0 %v3208_v45  ;;  %v2633_v35 = vld [vmem:[#allocation7 + $0x70] sm:$0xf0] }
  0x42   :  { %v136_v48 = vld [vmem:[#allocation2 + $0x50] sm:$0xff]  ;;  %v3191_v51 = vld [vmem:[#allocation7 + $0x4c0] sm:$0xf]  ;;  %v4362_v55 = vpack.c.bf16 %v133_v43, %v126_v42  ;;  %v3352_v59 = vor.u32 %v3949_v38, %v3351_v37  ;;  %1407 = vmatpush.bf16.msrb.mxu1 %v3336_v49  ;;  %v3767_v34 = vld [vmem:[#allocation7 + $0x64] sm:$0xf]  ;;  %v2780_v38 = vor.u32 %v3803_v26, %v2777_v27 }
  0x43   :  { %v3909_v52 = vld [vmem:[#allocation7 + $0x4cc] sm:$0xf0]  ;;  %v3319_v53 = vld [vmem:[#allocation7 + $0x5c0] sm:$0xf]  ;;  %v4364_v60 = vpack.c.bf16 %v136_v48, %v129_v47  ;;  %1373 = vmatmul.bf16.vlgmr.msra.gmra.mxu2 %v4360_v54  ;;  %v139_v37 = vld [vmem:[#allocation2 + $0x68] sm:$0xff]  ;;  %v2636_v43 = vor.u32 %v3767_v34, %v2633_v35 }
  0x44   :  { %v3941_v56 = vld [vmem:[#allocation7 + $0x5cc] sm:$0xf0]  ;;  %v134_v62 = vld [vmem:[#allocation2 + $0x40] sm:$0xff]  ;;  %v3192_v0 = vor.u32 %v3909_v52, %v3191_v51  ;;  %1435 = vmatpush.bf16.msrb.mxu3 %v2700_v50  ;;  %1345 = vmatmul.bf16.vlgmr.msra.gmra.mxu0 %v4362_v55  ;;  %v2617_v49 = vld [vmem:[#allocation7 + $0x50] sm:$0xf0]  ;;  %v2764_v51 = vor.u32 %v3799_v40, %v2761_v41 }
  0x45   :  { %v3320_v3 = vor.u32 %v3941_v56, %v3319_v53  ;;  %v3175_v5 = vld [vmem:[#allocation7 + $0x4a0] sm:$0xf]  ;;  %v3905_v6 = vld [vmem:[#allocation7 + $0x4ac] sm:$0xf0]  ;;  %v4368_v8 = vpack.c.bf16 %v134_v62, %v127_v61  ;;  %1428 = vmatpush.bf16.msrb.mxu2 %v3352_v59  ;;  %1387 = vmatmul.bf16.vlgmr.msra.gmra.mxu3 %v4364_v60  ;;  %v3763_v48 = vld [vmem:[#allocation7 + $0x44] sm:$0xf] }
  0x46   :  { %v3303_v7 = vld [vmem:[#allocation7 + $0x5a0] sm:$0xf]  ;;  %v3937_v9 = vld [vmem:[#allocation7 + $0x5ac] sm:$0xf0]  ;;  %1394 = vmatpush.bf16.msrb.mxu0 %v3192_v0  ;;  %v3176_v13 = vor.u32 %v3905_v6, %v3175_v5  ;;  %v3795_v53 = vld [vmem:[#allocation7 + $0x144] sm:$0xf]  ;;  %v2620_v58 = vor.u32 %v3763_v48, %v2617_v49 }
  0x47   :  { %1408 = vmatpush.bf16.msrb.mxu1 %v3320_v3  ;;  %v3304_v16 = vor.u32 %v3937_v9, %v3303_v7  ;;  %v3159_v18 = vld [vmem:[#allocation7 + $0x480] sm:$0xf]  ;;  %v3901_v19 = vld [vmem:[#allocation7 + $0x48c] sm:$0xf0]  ;;  %v2745_v56 = vld [vmem:[#allocation7 + $0x150] sm:$0xf0] }
  0x48   :  { %1436 = vmatpush.bf16.msrb.mxu3 %v2684_v4  ;;  %v3287_v20 = vld [vmem:[#allocation7 + $0x580] sm:$0xf]  ;;  %1359 = vmatmul.bf16.vlgmr.msra.gmra.mxu1 %v4368_v8  ;;  %v3933_v21 = vld [vmem:[#allocation7 + $0x58c] sm:$0xf0]  ;;  %v3160_v25 = vor.u32 %v3901_v19, %v3159_v18  ;;  %v3759_v0 = vld [vmem:[#allocation7 + $0x24] sm:$0xf]  ;;  %v2748_v4 = vor.u32 %v3795_v53, %v2745_v56 }
  0x49   :  { %1449 = vmatpush.bf16.msra.mxu2 %v2828_v63  ;;  %v3288_v28 = vor.u32 %v3933_v21, %v3287_v20  ;;  %v3143_v30 = vld [vmem:[#allocation7 + $0x460] sm:$0xf]  ;;  %v3897_v31 = vld [vmem:[#allocation7 + $0x46c] sm:$0xf0]  ;;  %v2601_v1 = vld [vmem:[#allocation7 + $0x30] sm:$0xf0] }
  0x4a   :  { %1395 = vmatpush.bf16.msrb.mxu0 %v3176_v13  ;;  %v3271_v32 = vld [vmem:[#allocation7 + $0x560] sm:$0xf]  ;;  %v3929_v33 = vld [vmem:[#allocation7 + $0x56c] sm:$0xf0]  ;;  %v3144_v39 = vor.u32 %v3897_v31, %v3143_v30  ;;  %v3791_v2 = vld [vmem:[#allocation7 + $0x124] sm:$0xf]  ;;  %v2604_v11 = vor.u32 %v3759_v0, %v2601_v1 }
  0x4b   :  { %1409 = vmatpush.bf16.msrb.mxu1 %v3304_v16  ;;  %v132_v36 = vld [vmem:[#allocation2 + $0x30] sm:$0xff]  ;;  %v3272_v42 = vor.u32 %v3929_v33, %v3271_v32  ;;  %v3127_v44 = vld [vmem:[#allocation7 + $0x440] sm:$0xf]  ;;  %v3755_v13 = vld [vmem:[#allocation7 + $0x4] sm:$0xf] }
  0x4c   :  { %1437 = vmatpush.bf16.msrb.mxu3 %v2668_v17  ;;  %v3893_v45 = vld [vmem:[#allocation7 + $0x44c] sm:$0xf0]  ;;  %v3255_v46 = vld [vmem:[#allocation7 + $0x540] sm:$0xf]  ;;  %v4372_v50 = vpack.c.bf16 %v139_v37, %v132_v36  ;;  %v2729_v3 = vld [vmem:[#allocation7 + $0x130] sm:$0xf0] }
  0x4d   :  { %1450 = vmatpush.bf16.msra.mxu2 %v2812_v12  ;;  %v3925_v47 = vld [vmem:[#allocation7 + $0x54c] sm:$0xf0]  ;;  %v3128_v52 = vor.u32 %v3893_v45, %v3127_v44  ;;  %v3111_v59 = vld [vmem:[#allocation7 + $0x420] sm:$0xf]  ;;  %v2585_v14 = vld [vmem:[#allocation7 + $0x10] sm:$0xf0]  ;;  %v2732_v21 = vor.u32 %v3791_v2, %v2729_v3 }
  0x4e   :  { %1396 = vmatpush.bf16.msrb.mxu0 %v3160_v25  ;;  %v3256_v57 = vor.u32 %v3925_v47, %v3255_v46  ;;  %v3889_v61 = vld [vmem:[#allocation7 + $0x42c] sm:$0xf0]  ;;  %v3239_v62 = vld [vmem:[#allocation7 + $0x520] sm:$0xf]  ;;  %v3847_v15 = vld [vmem:[#allocation7 + $0x2e4] sm:$0xf]  ;;  %v2588_v27 = vor.u32 %v3755_v13, %v2585_v14 }
  0x4f   :  { %1410 = vmatpush.bf16.msrb.mxu1 %v3288_v28  ;;  %v3921_v63 = vld [vmem:[#allocation7 + $0x52c] sm:$0xf0]  ;;  %v3112_v5 = vor.u32 %v3889_v61, %v3111_v59  ;;  %v3095_v6 = vld [vmem:[#allocation7 + $0x400] sm:$0xf]  ;;  %v2953_v16 = vld [vmem:[#allocation7 + $0x2f0] sm:$0xf0] }
  0x50   :  { %1438 = vmatpush.bf16.msrb.mxu3 %v2652_v29  ;;  %v3885_v7 = vld [vmem:[#allocation7 + $0x40c] sm:$0xf0]  ;;  %v3223_v9 = vld [vmem:[#allocation7 + $0x500] sm:$0xf]  ;;  %v3240_v10 = vor.u32 %v3921_v63, %v3239_v62  ;;  %v3879_v17 = vld [vmem:[#allocation7 + $0x3e4] sm:$0xf]  ;;  %v2956_v31 = vor.u32 %v3847_v15, %v2953_v16 }
  0x51   :  { %1451 = vmatpush.bf16.msra.mxu2 %v2796_v24  ;;  %v3917_v12 = vld [vmem:[#allocation7 + $0x50c] sm:$0xf0]  ;;  %v3081_v18 = vld [vmem:[#allocation7 + $0x3f0] sm:$0xf0]  ;;  %v3911_v19 = vld [vmem:[#allocation7 + $0x4e4] sm:$0xf]  ;;  %v3096_v22 = vor.u32 %v3885_v7, %v3095_v6 }
  0x52   :  { %1397 = vmatpush.bf16.msrb.mxu0 %v3144_v39  ;;  %v3209_v20 = vld [vmem:[#allocation7 + $0x4f0] sm:$0xf0]  ;;  %v130_v23 = vld [vmem:[#allocation2 + $0x20] sm:$0xff]  ;;  %v137_v24 = vld [vmem:[#allocation2 + $0x58] sm:$0xff]  ;;  %v3224_v26 = vor.u32 %v3917_v12, %v3223_v9  ;;  %v3084_v32 = vor.u32 %v3879_v17, %v3081_v18 }
  0x53   :  { %1411 = vmatpush.bf16.msrb.mxu1 %v3272_v42  ;;  %3365 = vmatmul.msk.bf16.vlgmr.msrb.gmra.mxu2 %vm1333_vm0, %v4372_v50  ;;  %v3787_v25 = vld [vmem:[#allocation7 + $0x104] sm:$0xf]  ;;  %v2713_v28 = vld [vmem:[#allocation7 + $0x110] sm:$0xf0]  ;;  %v131_v29 = vld [vmem:[#allocation2 + $0x28] sm:$0xff]  ;;  %v3212_v36 = vor.u32 %v3911_v19, %v3209_v20  ;;  %v4376_v37 = vpack.c.bf16 %v137_v24, %v130_v23 }
  0x54   :  { %1439 = vmatpush.bf16.msrb.mxu3 %v2636_v43  ;;  %v138_v30 = vld [vmem:[#allocation2 + $0x60] sm:$0xff]  ;;  %v3337_v34 = vld [vmem:[#allocation7 + $0x5f0] sm:$0xf0]  ;;  %v2716_v41 = vor.u32 %v3787_v25, %v2713_v28 }
  0x55   :  { %1452 = vmatpush.bf16.msra.mxu2 %v2780_v38  ;;  %v3943_v33 = vld [vmem:[#allocation7 + $0x5e4] sm:$0xf]  ;;  %v2937_v38 = vld [vmem:[#allocation7 + $0x2d0] sm:$0xf0]  ;;  %v4378_v42 = vpack.c.bf16 %v138_v30, %v131_v29 }
  0x56   :  { %1398 = vmatpush.bf16.msrb.mxu0 %v3128_v52  ;;  %v3843_v35 = vld [vmem:[#allocation7 + $0x2c4] sm:$0xf]  ;;  %v3065_v40 = vld [vmem:[#allocation7 + $0x3d0] sm:$0xf0]  ;;  %v3340_v45 = vor.u32 %v3943_v33, %v3337_v34 }
  0x57   :  { %1412 = vmatpush.bf16.msrb.mxu1 %v3256_v57  ;;  %v3875_v39 = vld [vmem:[#allocation7 + $0x3c4] sm:$0xf]  ;;  %v3193_v44 = vld [vmem:[#allocation7 + $0x4d0] sm:$0xf0]  ;;  %v2940_v46 = vor.u32 %v3843_v35, %v2937_v38 }
  0x58   :  { %1440 = vmatpush.bf16.msrb.mxu3 %v2620_v58  ;;  %v3907_v43 = vld [vmem:[#allocation7 + $0x4c4] sm:$0xf]  ;;  %v3068_v47 = vor.u32 %v3875_v39, %v3065_v40  ;;  %v3321_v49 = vld [vmem:[#allocation7 + $0x5d0] sm:$0xf0] }
  0x59   :  { %1453 = vmatpush.bf16.msra.mxu2 %v2764_v51  ;;  %v3939_v48 = vld [vmem:[#allocation7 + $0x5c4] sm:$0xf]  ;;  %v3196_v52 = vor.u32 %v3907_v43, %v3193_v44  ;;  %v2921_v53 = vld [vmem:[#allocation7 + $0x2b0] sm:$0xf0] }
  0x5a   :  { %1399 = vmatpush.bf16.msrb.mxu0 %v3112_v5  ;;  %v3839_v51 = vld [vmem:[#allocation7 + $0x2a4] sm:$0xf]  ;;  %v3049_v57 = vld [vmem:[#allocation7 + $0x3b0] sm:$0xf0]  ;;  %v3324_v61 = vor.u32 %v3939_v48, %v3321_v49 }
  0x5b   :  { %1413 = vmatpush.bf16.msrb.mxu1 %v3240_v10  ;;  %v3871_v56 = vld [vmem:[#allocation7 + $0x3a4] sm:$0xf]  ;;  %v3177_v59 = vld [vmem:[#allocation7 + $0x4b0] sm:$0xf0]  ;;  %v2924_v62 = vor.u32 %v3839_v51, %v2921_v53 }
  0x5c   :  { %1441 = vmatpush.bf16.msrb.mxu3 %v2604_v11  ;;  %v3903_v58 = vld [vmem:[#allocation7 + $0x4a4] sm:$0xf]  ;;  %v3052_v63 = vor.u32 %v3871_v56, %v3049_v57  ;;  %v3305_v1 = vld [vmem:[#allocation7 + $0x5b0] sm:$0xf0] }
  0x5d   :  { %1454 = vmatpush.bf16.msra.mxu2 %v2748_v4  ;;  %v3935_v0 = vld [vmem:[#allocation7 + $0x5a4] sm:$0xf]  ;;  %v3180_v3 = vor.u32 %v3903_v58, %v3177_v59  ;;  %v2905_v4 = vld [vmem:[#allocation7 + $0x290] sm:$0xf0] }
  0x5e   :  { %1400 = vmatpush.bf16.msrb.mxu0 %v3096_v22  ;;  %v3835_v2 = vld [vmem:[#allocation7 + $0x284] sm:$0xf]  ;;  %v3033_v6 = vld [vmem:[#allocation7 + $0x390] sm:$0xf0]  ;;  %v3308_v10 = vor.u32 %v3935_v0, %v3305_v1  ;;  %v2703_v0 = vld [vmem:[#allocation7 + $0xe8] sm:$0xf] }
  0x5f   :  { %1414 = vmatpush.bf16.msrb.mxu1 %v3224_v26  ;;  %v3867_v5 = vld [vmem:[#allocation7 + $0x384] sm:$0xf]  ;;  %v3161_v9 = vld [vmem:[#allocation7 + $0x490] sm:$0xf0]  ;;  %v2908_v11 = vor.u32 %v3835_v2, %v2905_v4  ;;  %v3786_v1 = vld [vmem:[#allocation7 + $0xf4] sm:$0xf0] }
  0x60   :  { %1442 = vmatpush.bf16.msrb.mxu3 %v2588_v27  ;;  %v3899_v7 = vld [vmem:[#allocation7 + $0x484] sm:$0xf]  ;;  %v3036_v12 = vor.u32 %v3867_v5, %v3033_v6  ;;  %v3289_v14 = vld [vmem:[#allocation7 + $0x590] sm:$0xf0]  ;;  %v2959_v5 = vld [vmem:[#allocation7 + $0x2e8] sm:$0xf] }
  0x61   :  { %1455 = vmatpush.bf16.msra.mxu2 %v2732_v21  ;;  %1401 = vmatmul.bf16.vlgmr.msrb.gmra.mxu0 %v4376_v37  ;;  %v3931_v13 = vld [vmem:[#allocation7 + $0x584] sm:$0xf]  ;;  %v3164_v16 = vor.u32 %v3899_v7, %v3161_v9  ;;  %v2889_v17 = vld [vmem:[#allocation7 + $0x270] sm:$0xf0]  ;;  %v3850_v6 = vld [vmem:[#allocation7 + $0x2f4] sm:$0xf0] }
  0x62   :  { %1463 = vmatpush.bf16.msra.mxu0 %v2956_v31  ;;  %1415 = vmatmul.bf16.vlgmr.msrb.gmra.mxu1 %v4378_v42  ;;  %v3831_v15 = vld [vmem:[#allocation7 + $0x264] sm:$0xf]  ;;  %v3017_v19 = vld [vmem:[#allocation7 + $0x370] sm:$0xf0]  ;;  %v3292_v22 = vor.u32 %v3931_v13, %v3289_v14  ;;  %v2704_v13 = vor.u32 %v3786_v1, %v2703_v0  ;;  %v3087_v14 = vld [vmem:[#allocation7 + $0x3e8] sm:$0xf] }
  0x63   :  { %1477 = vmatpush.bf16.msra.mxu1 %v3084_v32  ;;  %1443 = vmatmul.bf16.vlgmr.msrb.gmra.mxu3 %v4362_v55  ;;  %v3863_v18 = vld [vmem:[#allocation7 + $0x364] sm:$0xf]  ;;  %v3145_v21 = vld [vmem:[#allocation7 + $0x470] sm:$0xf0]  ;;  %v2892_v23 = vor.u32 %v3831_v15, %v2889_v17  ;;  %v3882_v15 = vld [vmem:[#allocation7 + $0x3f4] sm:$0xf0] }
  0x64   :  { %1491 = vmatpush.bf16.msra.mxu3 %v3212_v36  ;;  %v3895_v20 = vld [vmem:[#allocation7 + $0x464] sm:$0xf]  ;;  %v3020_v24 = vor.u32 %v3863_v18, %v3017_v19  ;;  %v3273_v26 = vld [vmem:[#allocation7 + $0x570] sm:$0xf0]  ;;  %v2831_v17 = vld [vmem:[#allocation7 + $0x1e8] sm:$0xf]  ;;  %v2960_v19 = vor.u32 %v3850_v6, %v2959_v5 }
  0x65   :  { %1456 = vmatpush.bf16.msra.mxu2 %v2716_v41  ;;  %v3927_v25 = vld [vmem:[#allocation7 + $0x564] sm:$0xf]  ;;  %v3148_v28 = vor.u32 %v3895_v20, %v3145_v21  ;;  %v2873_v29 = vld [vmem:[#allocation7 + $0x250] sm:$0xf0]  ;;  %v3818_v18 = vld [vmem:[#allocation7 + $0x1f4] sm:$0xf0] }
  0x66   :  { %1464 = vmatpush.bf16.msra.mxu0 %v2940_v46  ;;  %v3827_v27 = vld [vmem:[#allocation7 + $0x244] sm:$0xf]  ;;  %v3001_v31 = vld [vmem:[#allocation7 + $0x350] sm:$0xf0]  ;;  %v3276_v34 = vor.u32 %v3927_v25, %v3273_v26  ;;  %v2687_v21 = vld [vmem:[#allocation7 + $0xc8] sm:$0xf]  ;;  %v2832_v26 = vor.u32 %v3818_v18, %v2831_v17 }
  0x67   :  { %1478 = vmatpush.bf16.msra.mxu1 %v3068_v47  ;;  %v3859_v30 = vld [vmem:[#allocation7 + $0x344] sm:$0xf]  ;;  %v3129_v33 = vld [vmem:[#allocation7 + $0x450] sm:$0xf0]  ;;  %v2876_v35 = vor.u32 %v3827_v27, %v2873_v29  ;;  %v3846_v25 = vld [vmem:[#allocation7 + $0x2d4] sm:$0xf0] }
  0x68   :  { %1492 = vmatpush.bf16.msra.mxu3 %v3196_v52  ;;  %1457 = vmatmul.bf16.vlgmr.msra.gmra.mxu2 %v4368_v8  ;;  %v3891_v32 = vld [vmem:[#allocation7 + $0x444] sm:$0xf]  ;;  %v3004_v36 = vor.u32 %v3859_v30, %v3001_v31  ;;  %v3257_v39 = vld [vmem:[#allocation7 + $0x550] sm:$0xf0]  ;;  %v3071_v27 = vld [vmem:[#allocation7 + $0x3c8] sm:$0xf] }
  0x69   :  { %1505 = vmatpush.bf16.msrb.mxu2 %v3340_v45  ;;  %v3923_v38 = vld [vmem:[#allocation7 + $0x544] sm:$0xf]  ;;  %v3132_v41 = vor.u32 %v3891_v32, %v3129_v33  ;;  %v2857_v43 = vld [vmem:[#allocation7 + $0x230] sm:$0xf0]  ;;  %v2815_v30 = vld [vmem:[#allocation7 + $0x1c8] sm:$0xf] }
  0x6a   :  { %1465 = vmatpush.bf16.msra.mxu0 %v2924_v62  ;;  %v3823_v40 = vld [vmem:[#allocation7 + $0x224] sm:$0xf]  ;;  %v2985_v45 = vld [vmem:[#allocation7 + $0x330] sm:$0xf0]  ;;  %v3260_v48 = vor.u32 %v3923_v38, %v3257_v39  ;;  %v3814_v31 = vld [vmem:[#allocation7 + $0x1d4] sm:$0xf0] }
  0x6b   :  { %1479 = vmatpush.bf16.msra.mxu1 %v3052_v63  ;;  %v3855_v44 = vld [vmem:[#allocation7 + $0x324] sm:$0xf]  ;;  %v3113_v47 = vld [vmem:[#allocation7 + $0x430] sm:$0xf0]  ;;  %v2860_v52 = vor.u32 %v3823_v40, %v2857_v43  ;;  %v2671_v33 = vld [vmem:[#allocation7 + $0xa8] sm:$0xf]  ;;  %v2816_v39 = vor.u32 %v3814_v31, %v2815_v30 }
  0x6c   :  { %1493 = vmatpush.bf16.msra.mxu3 %v3180_v3  ;;  %v3887_v46 = vld [vmem:[#allocation7 + $0x424] sm:$0xf]  ;;  %v3241_v51 = vld [vmem:[#allocation7 + $0x530] sm:$0xf0]  ;;  %v2988_v53 = vor.u32 %v3855_v44, %v2985_v45  ;;  %v3842_v38 = vld [vmem:[#allocation7 + $0x2b4] sm:$0xf0] }
  0x6d   :  { %1506 = vmatpush.bf16.msrb.mxu2 %v3324_v61  ;;  %v3919_v49 = vld [vmem:[#allocation7 + $0x524] sm:$0xf]  ;;  %v2841_v57 = vld [vmem:[#allocation7 + $0x210] sm:$0xf0]  ;;  %v3116_v59 = vor.u32 %v3887_v46, %v3113_v47  ;;  %v3055_v40 = vld [vmem:[#allocation7 + $0x3a8] sm:$0xf] }
  0x6e   :  { %1466 = vmatpush.bf16.msra.mxu0 %v2908_v11  ;;  %v3819_v56 = vld [vmem:[#allocation7 + $0x204] sm:$0xf]  ;;  %v2969_v61 = vld [vmem:[#allocation7 + $0x310] sm:$0xf0]  ;;  %v3244_v3 = vor.u32 %v3919_v49, %v3241_v51  ;;  %v2799_v44 = vld [vmem:[#allocation7 + $0x1a8] sm:$0xf] }
  0x6f   :  { %1480 = vmatpush.bf16.msra.mxu1 %v3036_v12  ;;  %v3851_v58 = vld [vmem:[#allocation7 + $0x304] sm:$0xf]  ;;  %v3097_v63 = vld [vmem:[#allocation7 + $0x410] sm:$0xf0]  ;;  %v2844_v7 = vor.u32 %v3819_v56, %v2841_v57  ;;  %v3810_v45 = vld [vmem:[#allocation7 + $0x1b4] sm:$0xf0] }
  0x70   :  { %1494 = vmatpush.bf16.msra.mxu3 %v3164_v16  ;;  %v3883_v62 = vld [vmem:[#allocation7 + $0x404] sm:$0xf]  ;;  %v3353_v4 = vld [vmem:[#allocation7 + $0x610] sm:$0xf0]  ;;  %v2972_v9 = vor.u32 %v3851_v58, %v2969_v61  ;;  %v2655_v47 = vld [vmem:[#allocation7 + $0x88] sm:$0xf] }
  0x71   :  { %1507 = vmatpush.bf16.msrb.mxu2 %v3308_v10  ;;  %v3947_v2 = vld [vmem:[#allocation7 + $0x604] sm:$0xf]  ;;  %v3225_v11 = vld [vmem:[#allocation7 + $0x510] sm:$0xf0]  ;;  %v3100_v12 = vor.u32 %v3883_v62, %v3097_v63  ;;  %v2911_v51 = vld [vmem:[#allocation7 + $0x288] sm:$0xf] }
  0x72   :  { %1467 = vmatpush.bf16.msra.mxu0 %v2892_v23  ;;  %v3915_v10 = vld [vmem:[#allocation7 + $0x504] sm:$0xf]  ;;  %v3356_v16 = vor.u32 %v3947_v2, %v3353_v4  ;;  %v3088_v23 = vor.u32 %v3882_v15, %v3087_v14  ;;  %v3039_v56 = vld [vmem:[#allocation7 + $0x388] sm:$0xf]  ;;  %v3870_v57 = vld [vmem:[#allocation7 + $0x394] sm:$0xf0] }
  0x73   :  { %1481 = vmatpush.bf16.msra.mxu1 %v3020_v24  ;;  %v3228_v20 = vor.u32 %v3915_v10, %v3225_v11  ;;  %v2943_v24 = vld [vmem:[#allocation7 + $0x2c8] sm:$0xf]  ;;  %v3806_v61 = vld [vmem:[#allocation7 + $0x194] sm:$0xf0]  ;;  %v3040_v1 = vor.u32 %v3870_v57, %v3039_v56  ;;  %v3784_v56 = vld [vmem:[#allocation7 + $0xec] sm:$0xf] }
  0x74   :  { %1495 = vmatpush.bf16.msra.mxu3 %v3148_v28  ;;  %v3878_v28 = vld [vmem:[#allocation7 + $0x3d4] sm:$0xf0]  ;;  %v2944_v32 = vor.u32 %v3846_v25, %v2943_v24  ;;  %v2639_v63 = vld [vmem:[#allocation7 + $0x68] sm:$0xf]  ;;  %v2705_v57 = vld [vmem:[#allocation7 + $0xf8] sm:$0xf0] }
  0x75   :  { %1508 = vmatpush.bf16.msrb.mxu2 %v3292_v22  ;;  %v3782_v22 = vld [vmem:[#allocation7 + $0xd4] sm:$0xf0]  ;;  %v2895_v2 = vld [vmem:[#allocation7 + $0x268] sm:$0xf] }
  0x76   :  { %1468 = vmatpush.bf16.msra.mxu0 %v2876_v35  ;;  %v2688_v29 = vor.u32 %v3782_v22, %v2687_v21  ;;  %v3072_v35 = vor.u32 %v3878_v28, %v3071_v27  ;;  %v3770_v0 = vld [vmem:[#allocation7 + $0x74] sm:$0xf0]  ;;  %v3023_v5 = vld [vmem:[#allocation7 + $0x368] sm:$0xf] }
  0x77   :  { %1482 = vmatpush.bf16.msra.mxu1 %v3004_v36  ;;  %v2927_v36 = vld [vmem:[#allocation7 + $0x2a8] sm:$0xf]  ;;  %v3866_v6 = vld [vmem:[#allocation7 + $0x374] sm:$0xf0] }
  0x78   :  { %1496 = vmatpush.bf16.msra.mxu3 %v3132_v41  ;;  %v3874_v41 = vld [vmem:[#allocation7 + $0x3b4] sm:$0xf0]  ;;  %v2928_v46 = vor.u32 %v3842_v38, %v2927_v36  ;;  %v3024_v14 = vor.u32 %v3866_v6, %v3023_v5  ;;  %v2879_v15 = vld [vmem:[#allocation7 + $0x248] sm:$0xf]  ;;  %v2708_v6 = vor.u32 %v3784_v56, %v2705_v57 }
  0x79   :  { %1509 = vmatpush.bf16.msrb.mxu2 %v3276_v34  ;;  %v3778_v34 = vld [vmem:[#allocation7 + $0xb4] sm:$0xf0]  ;;  %v3056_v49 = vor.u32 %v3874_v41, %v3055_v40  ;;  %v3007_v18 = vld [vmem:[#allocation7 + $0x348] sm:$0xf] }
  0x7a   :  { %1469 = vmatpush.bf16.msra.mxu0 %v2860_v52  ;;  %v2672_v43 = vor.u32 %v3778_v34, %v2671_v33  ;;  %v3838_v52 = vld [vmem:[#allocation7 + $0x294] sm:$0xf0]  ;;  %v2751_v21 = vld [vmem:[#allocation7 + $0x148] sm:$0xf] }
  0x7b   :  { %1483 = vmatpush.bf16.msra.mxu1 %v2988_v53  ;;  %v2800_v53 = vor.u32 %v3810_v45, %v2799_v44  ;;  %v2912_v62 = vor.u32 %v3838_v52, %v2911_v51  ;;  %v3802_v10 = vld [vmem:[#allocation7 + $0x174] sm:$0xf0]  ;;  %v2607_v24 = vld [vmem:[#allocation7 + $0x28] sm:$0xf] }
  0x7c   :  { %1497 = vmatpush.bf16.msra.mxu3 %v3116_v59  ;;  %v2783_v59 = vld [vmem:[#allocation7 + $0x188] sm:$0xf]  ;;  %v3798_v22 = vld [vmem:[#allocation7 + $0x154] sm:$0xf0] }
  0x7d   :  { %1510 = vmatpush.bf16.msrb.mxu2 %v3260_v48  ;;  %v3774_v48 = vld [vmem:[#allocation7 + $0x94] sm:$0xf0]  ;;  %v2784_v4 = vor.u32 %v3806_v61, %v2783_v59  ;;  %v2863_v27 = vld [vmem:[#allocation7 + $0x228] sm:$0xf] }
  0x7e   :  { %1470 = vmatpush.bf16.msra.mxu0 %v2844_v7  ;;  %v2656_v58 = vor.u32 %v3774_v48, %v2655_v47  ;;  %v2640_v7 = vor.u32 %v3770_v0, %v2639_v63  ;;  %v3762_v25 = vld [vmem:[#allocation7 + $0x34] sm:$0xf0]  ;;  %v2991_v30 = vld [vmem:[#allocation7 + $0x328] sm:$0xf] }
  0x7f   :  { %1484 = vmatpush.bf16.msra.mxu1 %v2972_v9  ;;  %v2767_v9 = vld [vmem:[#allocation7 + $0x168] sm:$0xf]  ;;  %v3826_v28 = vld [vmem:[#allocation7 + $0x234] sm:$0xf0] }
  0x80   :  { %1498 = vmatpush.bf16.msra.mxu3 %v3100_v12  ;;  %v2623_v12 = vld [vmem:[#allocation7 + $0x48] sm:$0xf]  ;;  %v2768_v17 = vor.u32 %v3802_v10, %v2767_v9  ;;  %v3858_v31 = vld [vmem:[#allocation7 + $0x334] sm:$0xf0]  ;;  %v2864_v36 = vor.u32 %v3826_v28, %v2863_v27  ;;  %v3780_v9 = vld [vmem:[#allocation7 + $0xcc] sm:$0xf] }
  0x81   :  { %1511 = vmatpush.bf16.msrb.mxu2 %v3244_v3  ;;  %1471 = vmatmul.bf16.vlgmr.msra.gmra.mxu0 %v4360_v54  ;;  %v3834_v3 = vld [vmem:[#allocation7 + $0x274] sm:$0xf0]  ;;  %v2735_v33 = vld [vmem:[#allocation7 + $0x128] sm:$0xf]  ;;  %v2992_v41 = vor.u32 %v3858_v31, %v2991_v30  ;;  %v2689_v10 = vld [vmem:[#allocation7 + $0xd8] sm:$0xf0] }
  0x82   :  { %1561 = vmatpush.bf16.msrb.mxu0 %v2960_v19  ;;  %1485 = vmatmul.bf16.vlgmr.msra.gmra.mxu1 %v4364_v60  ;;  %v2896_v11 = vor.u32 %v3834_v3, %v2895_v2  ;;  %v3862_v19 = vld [vmem:[#allocation7 + $0x354] sm:$0xf0]  ;;  %v2847_v44 = vld [vmem:[#allocation7 + $0x208] sm:$0xf]  ;;  %v3816_v3 = vld [vmem:[#allocation7 + $0x1ec] sm:$0xf] }
  0x83   :  { %1533 = vmatpush.bf16.msrb.mxu1 %v2704_v13  ;;  %1499 = vmatmul.bf16.vlgmr.msra.gmra.mxu3 %v4376_v37  ;;  %v3766_v13 = vld [vmem:[#allocation7 + $0x54] sm:$0xf0]  ;;  %v3343_v61 = vld [vmem:[#allocation7 + $0x5e8] sm:$0xf]  ;;  %v2801_v30 = vld [vmem:[#allocation7 + $0x1b8] sm:$0xf0] }
  0x84   :  { %1526 = vmatpush.bf16.msrb.mxu3 %v3356_v16  ;;  %v3830_v16 = vld [vmem:[#allocation7 + $0x254] sm:$0xf0]  ;;  %v3199_v63 = vld [vmem:[#allocation7 + $0x4c8] sm:$0xf] }
  0x85   :  { %1512 = vmatpush.bf16.msrb.mxu2 %v3228_v20  ;;  %v2624_v20 = vor.u32 %v3766_v13, %v2623_v12  ;;  %v3794_v34 = vld [vmem:[#allocation7 + $0x134] sm:$0xf0]  ;;  %v3327_v13 = vld [vmem:[#allocation7 + $0x5c8] sm:$0xf] }
  0x86   :  { %1562 = vmatpush.bf16.msrb.mxu0 %v2944_v32  ;;  %v2608_v32 = vor.u32 %v3762_v25, %v2607_v24  ;;  %v3758_v38 = vld [vmem:[#allocation7 + $0x14] sm:$0xf0]  ;;  %v2736_v47 = vor.u32 %v3794_v34, %v2735_v33  ;;  %v3311_v25 = vld [vmem:[#allocation7 + $0x5a8] sm:$0xf]  ;;  %v3772_v33 = vld [vmem:[#allocation7 + $0x8c] sm:$0xf] }
  0x87   :  { %1534 = vmatpush.bf16.msrb.mxu1 %v2688_v29  ;;  %v2752_v29 = vor.u32 %v3798_v22, %v2751_v21  ;;  %v3914_v40 = vld [vmem:[#allocation7 + $0x4f4] sm:$0xf0]  ;;  %v3776_v21 = vld [vmem:[#allocation7 + $0xac] sm:$0xf]  ;;  %v2673_v22 = vld [vmem:[#allocation7 + $0xb8] sm:$0xf0] }
  0x88   :  { %1547 = vmatpush.bf16.msra.mxu3 %v2832_v26  ;;  %1513 = vmatmul.bf16.vlgmr.msrb.gmra.mxu2 %v4378_v42  ;;  %v3008_v26 = vor.u32 %v3862_v19, %v3007_v18  ;;  %v3822_v45 = vld [vmem:[#allocation7 + $0x214] sm:$0xf0]  ;;  %v2817_v18 = vld [vmem:[#allocation7 + $0x1d8] sm:$0xf0]  ;;  %v2692_v19 = vor.u32 %v3780_v9, %v2689_v10  ;;  %v3167_v27 = vld [vmem:[#allocation7 + $0x488] sm:$0xf]  ;;  %v2676_v31 = vor.u32 %v3776_v21, %v2673_v22 }
  0x89   :  { %1575 = vmatpush.bf16.msra.mxu2 %v3088_v23  ;;  %v2880_v23 = vor.u32 %v3830_v16, %v2879_v15  ;;  %v3854_v48 = vld [vmem:[#allocation7 + $0x314] sm:$0xf0]  ;;  %v2848_v59 = vor.u32 %v3822_v45, %v2847_v44  ;;  %v3183_v15 = vld [vmem:[#allocation7 + $0x4a8] sm:$0xf]  ;;  %v2657_v34 = vld [vmem:[#allocation7 + $0x98] sm:$0xf0] }
  0x8a   :  { %1563 = vmatpush.bf16.msrb.mxu0 %v2928_v46  ;;  %v2975_v46 = vld [vmem:[#allocation7 + $0x308] sm:$0xf]  ;;  %v3950_v51 = vld [vmem:[#allocation7 + $0x614] sm:$0xf0]  ;;  %v2785_v44 = vld [vmem:[#allocation7 + $0x198] sm:$0xf0]  ;;  %v2660_v45 = vor.u32 %v3772_v33, %v2657_v34 }
  0x8b   :  { %1535 = vmatpush.bf16.msrb.mxu1 %v2672_v43  ;;  %v2719_v43 = vld [vmem:[#allocation7 + $0x108] sm:$0xf]  ;;  %v2976_v0 = vor.u32 %v3854_v48, %v2975_v46  ;;  %v3906_v16 = vld [vmem:[#allocation7 + $0x4b4] sm:$0xf0]  ;;  %v2641_v48 = vld [vmem:[#allocation7 + $0x78] sm:$0xf0] }
  0x8c   :  { %1548 = vmatpush.bf16.msra.mxu3 %v2816_v39  ;;  %v3215_v39 = vld [vmem:[#allocation7 + $0x4e8] sm:$0xf]  ;;  %v3902_v28 = vld [vmem:[#allocation7 + $0x494] sm:$0xf0]  ;;  %v2753_v9 = vld [vmem:[#allocation7 + $0x158] sm:$0xf0] }
  0x8d   :  { %1576 = vmatpush.bf16.msra.mxu2 %v3072_v35  ;;  %v2591_v35 = vld [vmem:[#allocation7 + $0x8] sm:$0xf]  ;;  %v3894_v57 = vld [vmem:[#allocation7 + $0x454] sm:$0xf0]  ;;  %v2737_v21 = vld [vmem:[#allocation7 + $0x138] sm:$0xf0] }
  0x8e   :  { %1564 = vmatpush.bf16.msrb.mxu0 %v2912_v62  ;;  %v2592_v52 = vor.u32 %v3758_v38, %v2591_v35  ;;  %v3946_v62 = vld [vmem:[#allocation7 + $0x5f4] sm:$0xf0]  ;;  %v3168_v35 = vor.u32 %v3902_v28, %v3167_v27  ;;  %v3295_v38 = vld [vmem:[#allocation7 + $0x588] sm:$0xf]  ;;  %v3756_v27 = vld [vmem:[#allocation7 + $0xc] sm:$0xf] }
  0x8f   :  { %1536 = vmatpush.bf16.msrb.mxu1 %v2656_v58  ;;  %v3216_v58 = vor.u32 %v3914_v40, %v3215_v39  ;;  %v3934_v39 = vld [vmem:[#allocation7 + $0x594] sm:$0xf0]  ;;  %v3151_v40 = vld [vmem:[#allocation7 + $0x468] sm:$0xf]  ;;  %v2593_v28 = vld [vmem:[#allocation7 + $0x18] sm:$0xf0] }
  0x90   :  { %1549 = vmatpush.bf16.msra.mxu3 %v2800_v53  ;;  %v3790_v53 = vld [vmem:[#allocation7 + $0x114] sm:$0xf0]  ;;  %v3296_v46 = vor.u32 %v3934_v39, %v3295_v38  ;;  %v3135_v56 = vld [vmem:[#allocation7 + $0x448] sm:$0xf]  ;;  %v3089_v33 = vld [vmem:[#allocation7 + $0x3f8] sm:$0xf0]  ;;  %v2596_v39 = vor.u32 %v3756_v27, %v2593_v28 }
  0x91   :  { %1577 = vmatpush.bf16.msra.mxu2 %v3056_v49  ;;  %v3359_v49 = vld [vmem:[#allocation7 + $0x608] sm:$0xf]  ;;  %v2720_v5 = vor.u32 %v3790_v53, %v2719_v43  ;;  %v3804_v43 = vld [vmem:[#allocation7 + $0x18c] sm:$0xf]  ;;  %v3930_v53 = vld [vmem:[#allocation7 + $0x574] sm:$0xf0] }
  0x92   :  { %1565 = vmatpush.bf16.msrb.mxu0 %v2896_v11  ;;  %v3360_v2 = vor.u32 %v3950_v51, %v3359_v49  ;;  %v2788_v51 = vor.u32 %v3804_v43, %v2785_v44  ;;  %v3844_v38 = vld [vmem:[#allocation7 + $0x2cc] sm:$0xf]  ;;  %v2721_v43 = vld [vmem:[#allocation7 + $0x118] sm:$0xf0] }
  0x93   :  { %1537 = vmatpush.bf16.msrb.mxu1 %v2640_v7  ;;  %3366 = vmatmul.msk.bf16.vlgmr.msrb.gmra.mxu3 %vm1333_vm0, %v4372_v50  ;;  %v3344_v7 = vor.u32 %v3946_v62, %v3343_v61  ;;  %v3025_v28 = vld [vmem:[#allocation7 + $0x378] sm:$0xf0] }
  0x94   :  { %1550 = vmatpush.bf16.msra.mxu3 %v2784_v4  ;;  %v2833_v4 = vld [vmem:[#allocation7 + $0x1f8] sm:$0xf0] }
  0x95   :  { %1578 = vmatpush.bf16.msra.mxu2 %v3040_v1  ;;  %v3910_v1 = vld [vmem:[#allocation7 + $0x4d4] sm:$0xf0]  ;;  %v2836_v12 = vor.u32 %v3816_v3, %v2833_v4  ;;  %v3263_v3 = vld [vmem:[#allocation7 + $0x548] sm:$0xf] }
  0x96   :  { %1566 = vmatpush.bf16.msrb.mxu0 %v2880_v23  ;;  %v3200_v11 = vor.u32 %v3910_v1, %v3199_v63  ;;  %v3184_v23 = vor.u32 %v3906_v16, %v3183_v15  ;;  %v3764_v63 = vld [vmem:[#allocation7 + $0x4c] sm:$0xf]  ;;  %v3136_v1 = vor.u32 %v3894_v57, %v3135_v56  ;;  %v3926_v4 = vld [vmem:[#allocation7 + $0x554] sm:$0xf0]  ;;  %v3247_v16 = vld [vmem:[#allocation7 + $0x528] sm:$0xf] }
  0x97   :  { %1538 = vmatpush.bf16.msrb.mxu1 %v2624_v20  ;;  %v3908_v56 = vld [vmem:[#allocation7 + $0x4cc] sm:$0xf]  ;;  %v3201_v57 = vld [vmem:[#allocation7 + $0x4d8] sm:$0xf0] }
  0x98   :  { %1551 = vmatpush.bf16.msra.mxu3 %v2768_v17  ;;  %v3812_v17 = vld [vmem:[#allocation7 + $0x1cc] sm:$0xf] }
  0x99   :  { %1579 = vmatpush.bf16.msra.mxu2 %v3024_v14  ;;  %v3942_v14 = vld [vmem:[#allocation7 + $0x5d4] sm:$0xf0]  ;;  %v2820_v24 = vor.u32 %v3812_v17, %v2817_v18  ;;  %v3103_v18 = vld [vmem:[#allocation7 + $0x408] sm:$0xf] }
  0x9a   :  { %1567 = vmatpush.bf16.msrb.mxu0 %v2864_v36  ;;  %v3328_v20 = vor.u32 %v3942_v14, %v3327_v13  ;;  %v2609_v13 = vld [vmem:[#allocation7 + $0x38] sm:$0xf0]  ;;  %v3922_v17 = vld [vmem:[#allocation7 + $0x534] sm:$0xf0] }
  0x9b   :  { %1539 = vmatpush.bf16.msrb.mxu1 %v2608_v32 }
  0x9c   :  { %1552 = vmatpush.bf16.msra.mxu3 %v2752_v29  ;;  %v3808_v29 = vld [vmem:[#allocation7 + $0x1ac] sm:$0xf] }
  0x9d   :  { %1580 = vmatpush.bf16.msra.mxu2 %v3008_v26  ;;  %v3938_v26 = vld [vmem:[#allocation7 + $0x5b4] sm:$0xf0]  ;;  %v2804_v36 = vor.u32 %v3808_v29, %v2801_v30 }
  0x9e   :  { %1568 = vmatpush.bf16.msrb.mxu0 %v2848_v59  ;;  %v3312_v32 = vor.u32 %v3938_v26, %v3311_v25  ;;  %v2769_v59 = vld [vmem:[#allocation7 + $0x178] sm:$0xf0]  ;;  %v3248_v25 = vor.u32 %v3922_v17, %v3247_v16  ;;  %v3231_v26 = vld [vmem:[#allocation7 + $0x508] sm:$0xf] }
  0x9f   :  { %1540 = vmatpush.bf16.msrb.mxu1 %v2592_v52  ;;  %v3279_v52 = vld [vmem:[#allocation7 + $0x568] sm:$0xf]  ;;  %v3041_v17 = vld [vmem:[#allocation7 + $0x398] sm:$0xf0] }
  0xa0   :  { %1553 = vmatpush.bf16.msra.mxu3 %v2736_v47  ;;  %v3768_v47 = vld [vmem:[#allocation7 + $0x6c] sm:$0xf]  ;;  %v3280_v62 = vor.u32 %v3930_v53, %v3279_v52  ;;  %v3073_v53 = vld [vmem:[#allocation7 + $0x3d8] sm:$0xf0] }
  0xa1   :  { %1581 = vmatpush.bf16.msra.mxu2 %v2992_v41  ;;  %1569 = vmatmul.bf16.vlgmr.msrb.gmra.mxu0 %v4360_v54  ;;  %v3898_v41 = vld [vmem:[#allocation7 + $0x474] sm:$0xf0]  ;;  %v2644_v61 = vor.u32 %v3768_v47, %v2641_v48 }
  0xa2   :  { %1624 = vmatpush.bf16.msra.mxu0 %v3360_v2  ;;  %1541 = vmatmul.bf16.vlgmr.msrb.gmra.mxu1 %v4362_v55  ;;  %v3152_v49 = vor.u32 %v3898_v41, %v3151_v40  ;;  %v2945_v40 = vld [vmem:[#allocation7 + $0x2d8] sm:$0xf0]  ;;  %v3788_v41 = vld [vmem:[#allocation7 + $0x10c] sm:$0xf] }
  0xa3   :  { %1589 = vmatpush.bf16.msra.mxu1 %v3216_v58  ;;  %v3800_v58 = vld [vmem:[#allocation7 + $0x16c] sm:$0xf]  ;;  %v2724_v52 = vor.u32 %v3788_v41, %v2721_v43  ;;  %v3137_v43 = vld [vmem:[#allocation7 + $0x458] sm:$0xf0] }
  0xa4   :  { %1554 = vmatpush.bf16.msra.mxu3 %v2720_v5  ;;  %v2772_v2 = vor.u32 %v3800_v58, %v2769_v59  ;;  %v3119_v5 = vld [vmem:[#allocation7 + $0x428] sm:$0xf]  ;;  %v3840_v59 = vld [vmem:[#allocation7 + $0x2ac] sm:$0xf] }
  0xa5   :  { %1582 = vmatpush.bf16.msra.mxu2 %v2976_v0  ;;  %v2625_v0 = vld [vmem:[#allocation7 + $0x58] sm:$0xf0]  ;;  %v3892_v41 = vld [vmem:[#allocation7 + $0x44c] sm:$0xf] }
  0xa6   :  { %1645 = vmatpush.bf16.msrb.mxu0 %v2836_v12  ;;  %v2628_v10 = vor.u32 %v3764_v63, %v2625_v0  ;;  %v3760_v12 = vld [vmem:[#allocation7 + $0x2c] sm:$0xf]  ;;  %v3329_v63 = vld [vmem:[#allocation7 + $0x5d8] sm:$0xf0] }
  0xa7   :  { %1590 = vmatpush.bf16.msra.mxu1 %v3200_v11  ;;  %1555 = vmatmul.bf16.vlgmr.msra.gmra.mxu3 %v4368_v8  ;;  %v3264_v11 = vor.u32 %v3926_v4, %v3263_v3  ;;  %v2612_v22 = vor.u32 %v3760_v12, %v2609_v13  ;;  %v3057_v4 = vld [vmem:[#allocation7 + $0x3b8] sm:$0xf0] }
  0xa8   :  { %1603 = vmatpush.bf16.msrb.mxu3 %v3344_v7  ;;  %1583 = vmatmul.bf16.vlgmr.msra.gmra.mxu2 %v4364_v60  ;;  %v3796_v7 = vld [vmem:[#allocation7 + $0x14c] sm:$0xf]  ;;  %v3313_v12 = vld [vmem:[#allocation7 + $0x5b8] sm:$0xf0] }
  0xa9   :  { %1631 = vmatpush.bf16.msrb.mxu2 %v2708_v6  ;;  %v3890_v6 = vld [vmem:[#allocation7 + $0x434] sm:$0xf0]  ;;  %v2756_v15 = vor.u32 %v3796_v7, %v2753_v9  ;;  %v3836_v9 = vld [vmem:[#allocation7 + $0x28c] sm:$0xf] }
  0xaa   :  { %1646 = vmatpush.bf16.msrb.mxu0 %v2820_v24  ;;  %v3120_v14 = vor.u32 %v3890_v6, %v3119_v5  ;;  %v2961_v24 = vld [vmem:[#allocation7 + $0x2f8] sm:$0xf0]  ;;  %v3904_v5 = vld [vmem:[#allocation7 + $0x4ac] sm:$0xf] }
  0xab   :  { %1591 = vmatpush.bf16.msra.mxu1 %v3184_v23  ;;  %v3848_v23 = vld [vmem:[#allocation7 + $0x2ec] sm:$0xf]  ;;  %v3185_v6 = vld [vmem:[#allocation7 + $0x4b8] sm:$0xf0] }
  0xac   :  { %1604 = vmatpush.bf16.msrb.mxu3 %v3328_v20  ;;  %v3792_v20 = vld [vmem:[#allocation7 + $0x12c] sm:$0xf]  ;;  %v2964_v34 = vor.u32 %v3848_v23, %v2961_v24 }
  0xad   :  { %1632 = vmatpush.bf16.msrb.mxu2 %v2692_v19  ;;  %v3886_v19 = vld [vmem:[#allocation7 + $0x414] sm:$0xf0]  ;;  %v2740_v30 = vor.u32 %v3792_v20, %v2737_v21  ;;  %v3832_v21 = vld [vmem:[#allocation7 + $0x26c] sm:$0xf] }
  0xae   :  { %1647 = vmatpush.bf16.msrb.mxu0 %v2804_v36  ;;  %v3104_v29 = vor.u32 %v3886_v19, %v3103_v18  ;;  %v3217_v36 = vld [vmem:[#allocation7 + $0x4f8] sm:$0xf0]  ;;  %v3900_v18 = vld [vmem:[#allocation7 + $0x48c] sm:$0xf] }
  0xaf   :  { %1592 = vmatpush.bf16.msra.mxu1 %v3168_v35  ;;  %v3912_v35 = vld [vmem:[#allocation7 + $0x4ec] sm:$0xf]  ;;  %v3169_v19 = vld [vmem:[#allocation7 + $0x498] sm:$0xf0] }
  0xb0   :  { %1605 = vmatpush.bf16.msrb.mxu3 %v3312_v32  ;;  %v3880_v32 = vld [vmem:[#allocation7 + $0x3ec] sm:$0xf]  ;;  %v3220_v48 = vor.u32 %v3912_v35, %v3217_v36 }
  0xb1   :  { %1633 = vmatpush.bf16.msrb.mxu2 %v2676_v31  ;;  %3367 = vmatmul.msk.bf16.vlgmr.msra.gmra.mxu0 %vm1333_vm0, %v4372_v50  ;;  %v3918_v31 = vld [vmem:[#allocation7 + $0x514] sm:$0xf0]  ;;  %v3092_v47 = vor.u32 %v3880_v32, %v3089_v33  ;;  %v3932_v23 = vld [vmem:[#allocation7 + $0x58c] sm:$0xf] }
  0xb2   :  { %1648 = vmatpush.bf16.msrb.mxu0 %v2788_v51  ;;  %v3232_v44 = vor.u32 %v3918_v31, %v3231_v26  ;;  %v2948_v51 = vor.u32 %v3844_v38, %v2945_v40  ;;  %v3864_v26 = vld [vmem:[#allocation7 + $0x36c] sm:$0xf]  ;;  %v3009_v40 = vld [vmem:[#allocation7 + $0x358] sm:$0xf0] }
  0xb3   :  { %1593 = vmatpush.bf16.msra.mxu1 %v3152_v49  ;;  %v3876_v49 = vld [vmem:[#allocation7 + $0x3cc] sm:$0xf]  ;;  %v3028_v35 = vor.u32 %v3864_v26, %v3025_v28 }
  0xb4   :  { %1606 = vmatpush.bf16.msrb.mxu3 %v3296_v46  ;;  %v3345_v46 = vld [vmem:[#allocation7 + $0x5f8] sm:$0xf0]  ;;  %v3076_v0 = vor.u32 %v3876_v49, %v3073_v53  ;;  %v3828_v32 = vld [vmem:[#allocation7 + $0x24c] sm:$0xf] }
  0xb5   :  { %1634 = vmatpush.bf16.msrb.mxu2 %v2660_v45  ;;  %v3944_v45 = vld [vmem:[#allocation7 + $0x5ec] sm:$0xf] }
  0xb6   :  { %1649 = vmatpush.bf16.msrb.mxu0 %v2772_v2  ;;  %v3348_v58 = vor.u32 %v3944_v45, %v3345_v46  ;;  %v3872_v2 = vld [vmem:[#allocation7 + $0x3ac] sm:$0xf]  ;;  %v2865_v46 = vld [vmem:[#allocation7 + $0x238] sm:$0xf0] }
  0xb7   :  { %1594 = vmatpush.bf16.msra.mxu1 %v3136_v1  ;;  %v3204_v1 = vor.u32 %v3908_v56, %v3201_v57  ;;  %v3060_v13 = vor.u32 %v3872_v2, %v3057_v4  ;;  %v3928_v33 = vld [vmem:[#allocation7 + $0x56c] sm:$0xf]  ;;  %v2993_v57 = vld [vmem:[#allocation7 + $0x338] sm:$0xf0] }
  0xb8   :  { %1607 = vmatpush.bf16.msrb.mxu3 %v3280_v62  ;;  %v3940_v62 = vld [vmem:[#allocation7 + $0x5cc] sm:$0xf]  ;;  %v3249_v2 = vld [vmem:[#allocation7 + $0x538] sm:$0xf0] }
  0xb9   :  { %1635 = vmatpush.bf16.msrb.mxu2 %v2644_v61  ;;  %v2929_v61 = vld [vmem:[#allocation7 + $0x2b8] sm:$0xf0]  ;;  %v3332_v7 = vor.u32 %v3940_v62, %v3329_v63  ;;  %v3860_v38 = vld [vmem:[#allocation7 + $0x34c] sm:$0xf] }
  0xba   :  { %1650 = vmatpush.bf16.msrb.mxu0 %v2756_v15  ;;  %v2932_v3 = vor.u32 %v3840_v59, %v2929_v61  ;;  %v3868_v15 = vld [vmem:[#allocation7 + $0x38c] sm:$0xf]  ;;  %v3012_v49 = vor.u32 %v3860_v38, %v3009_v40  ;;  %v3121_v59 = vld [vmem:[#allocation7 + $0x438] sm:$0xf0]  ;;  %v3411_v38 = vld [vmem:[#allocation10 + $0x50] sm:$0xf] }
  0xbb   :  { %1595 = vmatpush.bf16.msra.mxu1 %v3120_v14  ;;  %v3188_v14 = vor.u32 %v3904_v5, %v3185_v6  ;;  %v3044_v24 = vor.u32 %v3868_v15, %v3041_v17  ;;  %v3824_v45 = vld [vmem:[#allocation7 + $0x22c] sm:$0xf]  ;;  %v3361_v4 = vld [vmem:[#allocation7 + $0x618] sm:$0xf0] }
  0xbc   :  { %1608 = vmatpush.bf16.msrb.mxu3 %v3264_v11  ;;  %v3936_v11 = vld [vmem:[#allocation7 + $0x5ac] sm:$0xf]  ;;  %v2868_v56 = vor.u32 %v3824_v45, %v2865_v46  ;;  %v3966_v17 = vld [vmem:[#allocation10 + $0x74] sm:$0xf0] }
  0xbd   :  { %1636 = vmatpush.bf16.msrb.mxu2 %v2628_v10  ;;  %v2913_v10 = vld [vmem:[#allocation7 + $0x298] sm:$0xf0]  ;;  %v3316_v20 = vor.u32 %v3936_v11, %v3313_v12  ;;  %v3820_v63 = vld [vmem:[#allocation7 + $0x20c] sm:$0xf] }
  0xbe   :  { %1651 = vmatpush.bf16.msrb.mxu0 %v2740_v30  ;;  %v2916_v16 = vor.u32 %v3836_v9, %v2913_v10  ;;  %v3153_v30 = vld [vmem:[#allocation7 + $0x478] sm:$0xf0]  ;;  %v3852_v10 = vld [vmem:[#allocation7 + $0x30c] sm:$0xf] }
  0xbf   :  { %1596 = vmatpush.bf16.msra.mxu1 %v3104_v29  ;;  %v3896_v29 = vld [vmem:[#allocation7 + $0x46c] sm:$0xf]  ;;  %v2977_v11 = vld [vmem:[#allocation7 + $0x318] sm:$0xf0] }
  0xc0   :  { %1609 = vmatpush.bf16.msrb.mxu3 %v3248_v25  ;;  %v3172_v25 = vor.u32 %v3900_v18, %v3169_v19  ;;  %v3156_v36 = vor.u32 %v3896_v29, %v3153_v30  ;;  %v3884_v12 = vld [vmem:[#allocation7 + $0x40c] sm:$0xf]  ;;  %v4404_v18 = vld [vmem:[#allocation8] sm:$0xf] }
  0xc1   :  { %1637 = vmatpush.bf16.msrb.mxu2 %v2612_v22  ;;  %v2897_v22 = vld [vmem:[#allocation7 + $0x278] sm:$0xf0]  ;;  %v1346_v53 = vpop.f32.mrf.mxu0  ;;  %v3916_v19 = vld [vmem:[#allocation7 + $0x50c] sm:$0xf] }
  0xc2   :  { %1597 = vmatmul.bf16.vlgmr.msra.gmra.mxu1 %v4376_v37  ;;  %1652 = vmatpush.bf16.msrb.mxu0 %v2724_v52  ;;  %v2900_v27 = vor.u32 %v3832_v21, %v2897_v22  ;;  %v3856_v52 = vld [vmem:[#allocation7 + $0x32c] sm:$0xf]  ;;  %v2980_v21 = vor.u32 %v3852_v10, %v2977_v11 }
  0xc3   :  { %1659 = vmatpush.bf16.msrb.mxu1 %v2964_v34  ;;  %v3281_v34 = vld [vmem:[#allocation7 + $0x578] sm:$0xf0]  ;;  %v2996_v5 = vor.u32 %v3856_v52, %v2993_v57  ;;  %v3964_v28 = vld [vmem:[#allocation10 + $0x64] sm:$0xf0] }
  0xc4   :  { %1610 = vmatpush.bf16.msrb.mxu3 %v3232_v44  ;;  %v3284_v44 = vor.u32 %v3928_v33, %v3281_v34  ;;  %v3483_v33 = vld [vmem:[#allocation10 + $0xe0] sm:$0xf]  ;;  %v3980_v34 = vld [vmem:[#allocation10 + $0xe4] sm:$0xf0] }
  0xc5   :  { %1638 = vmatpush.bf16.msrb.mxu2 %v2596_v39  ;;  %1653 = vmatmul.bf16.vlgmr.msrb.gmra.mxu0 %v4368_v8  ;;  %v2881_v8 = vld [vmem:[#allocation7 + $0x258] sm:$0xf0]  ;;  %v4400_v61 = vpop.f32.mrf.mxu1  ;;  %v3484_v40 = vor.u32 %v3980_v34, %v3483_v33 }
  0xc6   :  { %1701 = vmatpush.bf16.msra.mxu0 %v3348_v58  ;;  %v2884_v39 = vor.u32 %v3828_v32, %v2881_v8  ;;  %v3888_v58 = vld [vmem:[#allocation7 + $0x42c] sm:$0xf] }
  0xc7   :  { %1660 = vmatpush.bf16.msrb.mxu1 %v2948_v51  ;;  %1611 = vmatmul.bf16.vlgmr.msrb.gmra.mxu3 %v4378_v42  ;;  %v3140_v51 = vor.u32 %v3892_v41, %v3137_v43  ;;  %v3124_v6 = vor.u32 %v3888_v58, %v3121_v59  ;;  %v3475_v43 = vld [vmem:[#allocation10 + $0xd0] sm:$0xf]  ;;  %v3958_v58 = vld [vmem:[#allocation10 + $0x34] sm:$0xf0] }
  0xc8   :  { %1673 = vmatpush.bf16.msra.mxu3 %v3092_v47  ;;  %1639 = vmatmul.bf16.vlgmr.msrb.gmra.mxu2 %v4362_v55  ;;  %v3297_v55 = vld [vmem:[#allocation7 + $0x598] sm:$0xf0]  ;;  %v3924_v47 = vld [vmem:[#allocation7 + $0x54c] sm:$0xf]  ;;  %v1388_v32 = vpop.f32.mrf.mxu3 }
  0xc9   :  { %1687 = vmatpush.bf16.msra.mxu2 %v3220_v48  ;;  %v3300_v31 = vor.u32 %v3932_v23, %v3297_v55  ;;  %v3265_v48 = vld [vmem:[#allocation7 + $0x558] sm:$0xf0]  ;;  %v3491_v55 = vld [vmem:[#allocation10 + $0xf0] sm:$0xf]  ;;  %v1348_v30 = vpop.f32.mrf.mxu0 }
  0xca   :  { %1702 = vmatpush.bf16.msra.mxu0 %v3332_v7  ;;  %v3268_v62 = vor.u32 %v3924_v47, %v3265_v48  ;;  %v4402_v7 = vpop.f32.mrf.mxu2  ;;  %v3403_v47 = vld [vmem:[#allocation10 + $0x40] sm:$0xf]  ;;  %v3960_v48 = vld [vmem:[#allocation10 + $0x44] sm:$0xf0] }
  0xcb   :  { %1661 = vmatpush.bf16.msrb.mxu1 %v2932_v3  ;;  %v3948_v3 = vld [vmem:[#allocation7 + $0x60c] sm:$0xf] }
  0xcc   :  { %1674 = vmatpush.bf16.msra.mxu3 %v3076_v0  ;;  %v2849_v0 = vld [vmem:[#allocation7 + $0x218] sm:$0xf0]  ;;  %v3364_v15 = vor.u32 %v3948_v3, %v3361_v4  ;;  %v3387_v4 = vld [vmem:[#allocation10 + $0x20] sm:$0xf] }
  0xcd   :  { %1688 = vmatpush.bf16.msra.mxu2 %v3204_v1  ;;  %v3920_v1 = vld [vmem:[#allocation7 + $0x52c] sm:$0xf]  ;;  %v2852_v9 = vor.u32 %v3820_v63, %v2849_v0  ;;  %v3459_v0 = vld [vmem:[#allocation10 + $0xb0] sm:$0xf] }
  0xce   :  { %1703 = vmatpush.bf16.msra.mxu0 %v3316_v20  ;;  %v3233_v20 = vld [vmem:[#allocation7 + $0x518] sm:$0xf0] }
  0xcf   :  { %1662 = vmatpush.bf16.msrb.mxu1 %v2916_v16  ;;  %v3427_v16 = vld [vmem:[#allocation10 + $0x70] sm:$0xf]  ;;  %v3236_v26 = vor.u32 %v3916_v19, %v3233_v20 }
  0xd0   :  { %1675 = vmatpush.bf16.msra.mxu3 %v3060_v13  ;;  %v3252_v13 = vor.u32 %v3920_v1, %v3249_v2  ;;  %v3428_v23 = vor.u32 %v3966_v17, %v3427_v16  ;;  %v3974_v1 = vld [vmem:[#allocation10 + $0xb4] sm:$0xf0]  ;;  %v3379_v16 = vld [vmem:[#allocation10 + $0x10] sm:$0xf] }
  0xd1   :  { %1689 = vmatpush.bf16.msra.mxu2 %v3188_v14  ;;  %v3105_v14 = vld [vmem:[#allocation7 + $0x418] sm:$0xf0] }
  0xd2   :  { %1704 = vmatpush.bf16.msra.mxu0 %v3300_v31  ;;  %v3108_v22 = vor.u32 %v3884_v12, %v3105_v14  ;;  %v1362_v31 = vpop.f32.mrf.mxu1  ;;  %v1376_v41 = vpop.f32.mrf.mxu2  ;;  %v3972_v14 = vld [vmem:[#allocation10 + $0xa4] sm:$0xf0]  ;;  %v3954_v17 = vld [vmem:[#allocation10 + $0x14] sm:$0xf0] }
  0xd3   :  { %1663 = vmatpush.bf16.msrb.mxu1 %v2900_v27  ;;  %v3419_v27 = vld [vmem:[#allocation10 + $0x60] sm:$0xf] }
  0xd4   :  { %1676 = vmatpush.bf16.msra.mxu3 %v3044_v24  ;;  %v3982_v24 = vld [vmem:[#allocation10 + $0xf4] sm:$0xf0]  ;;  %v3420_v8 = vor.u32 %v3964_v28, %v3419_v27  ;;  %v3965_v27 = vld [vmem:[#allocation10 + $0x74] sm:$0xf]  ;;  %v3429_v28 = vld [vmem:[#allocation10 + $0x78] sm:$0xf0] }
  0xd5   :  { %1690 = vmatpush.bf16.msra.mxu2 %v3172_v25  ;;  %v345_v25 = vperm.slane %v4404_v18, 0  ;;  %v3492_v29 = vor.u32 %v3982_v24, %v3491_v55  ;;  %v3970_v55 = vld [vmem:[#allocation10 + $0x94] sm:$0xf0]  ;;  %v3432_v34 = vor.u32 %v3965_v27, %v3429_v28  ;;  %v3445_v27 = vld [vmem:[#allocation10 + $0x98] sm:$0xf0] }
  0xd6   :  { %1705 = vmatpush.bf16.msra.mxu0 %v3284_v44  ;;  %v3978_v44 = vld [vmem:[#allocation10 + $0xd4] sm:$0xf0] }
  0xd7   :  { %1664 = vmatpush.bf16.msrb.mxu1 %v2884_v39  ;;  %v3962_v39 = vld [vmem:[#allocation10 + $0x54] sm:$0xf0] }
  0xd8   :  { %1677 = vmatpush.bf16.msra.mxu3 %v3028_v35  ;;  %v1347_v35 = vadd.f32 %v1346_v53, %v345_v25  ;;  %v3404_v53 = vor.u32 %v3960_v48, %v3403_v47  ;;  %v3961_v47 = vld [vmem:[#allocation10 + $0x54] sm:$0xf]  ;;  %v3413_v48 = vld [vmem:[#allocation10 + $0x58] sm:$0xf0] }
  0xd9   :  { %1691 = vmatpush.bf16.msra.mxu2 %v3156_v36  ;;  %v1349_v36 = vadd.f32 %v1348_v30, %v345_v25  ;;  %v3371_v25 = vld [vmem:[#allocation10] sm:$0xf] }
  0xda   :  { %1706 = vmatpush.bf16.msra.mxu0 %v3268_v62  ;;  %v1361_v45 = vadd.f32 %v4400_v61, %v1347_v35  ;;  %v1390_v62 = vpop.f32.mrf.mxu3  ;;  %v1430_v61 = vpop.f32.mrf.mxu2 }
  0xdb   :  { %1665 = vmatpush.bf16.msrb.mxu1 %v2868_v56  ;;  %v1363_v46 = vadd.f32 %v1362_v31, %v1349_v36  ;;  %v3976_v56 = vld [vmem:[#allocation10 + $0xc4] sm:$0xf0]  ;;  %v3435_v31 = vld [vmem:[#allocation10 + $0x80] sm:$0xf]  ;;  %v3981_v36 = vld [vmem:[#allocation10 + $0xf4] sm:$0xf] }
  0xdc   :  { %1678 = vmatpush.bf16.msra.mxu3 %v3012_v49  ;;  %v3476_v49 = vor.u32 %v3978_v44, %v3475_v43 }
  0xdd   :  { %1692 = vmatpush.bf16.msra.mxu2 %v3140_v51  ;;  %v1377_v57 = vadd.f32 %v1376_v41, %v1363_v46  ;;  %v3485_v46 = vld [vmem:[#allocation10 + $0xe8] sm:$0xf0] }
  0xde   :  { %1707 = vmatpush.bf16.msra.mxu0 %v3252_v13  ;;  %v1402_v51 = vpop.f32.mrf.mxu0  ;;  %v3451_v13 = vld [vmem:[#allocation10 + $0xa0] sm:$0xf] }
  0xdf   :  { %1666 = vmatpush.bf16.msrb.mxu1 %v2852_v9  ;;  %v1416_v52 = vpop.f32.mrf.mxu1  ;;  %v1391_v3 = vadd.f32 %v1390_v62, %v1377_v57  ;;  %v3452_v19 = vor.u32 %v3972_v14, %v3451_v13  ;;  %v3469_v62 = vld [vmem:[#allocation10 + $0xc8] sm:$0xf0] }
  0xe0   :  { %1679 = vmatpush.bf16.msra.mxu3 %v2996_v5  ;;  %v3956_v5 = vld [vmem:[#allocation10 + $0x24] sm:$0xf0] }
  0xe1   :  { %1693 = vmatpush.bf16.msra.mxu2 %v3124_v6  ;;  %v3460_v6 = vor.u32 %v3974_v1, %v3459_v0  ;;  %v3388_v12 = vor.u32 %v3956_v5, %v3387_v4  ;;  %v3955_v4 = vld [vmem:[#allocation10 + $0x24] sm:$0xf]  ;;  %v3389_v5 = vld [vmem:[#allocation10 + $0x28] sm:$0xf0] }
  0xe2   :  { %1667 = vmatmul.bf16.vlgmr.msrb.gmra.mxu1 %v4360_v54  ;;  %1708 = vmatpush.bf16.msra.mxu0 %v3236_v26  ;;  %v3412_v54 = vor.u32 %v3962_v39, %v3411_v38  ;;  %v3493_v38 = vld [vmem:[#allocation10 + $0xf8] sm:$0xf0]  ;;  %v3963_v39 = vld [vmem:[#allocation10 + $0x64] sm:$0xf] }
  0xe3   :  { %1722 = vmatpush.bf16.msra.mxu1 %v3364_v15  ;;  %v3496_v41 = vor.u32 %v3981_v36, %v3493_v38 }
  0xe4   :  { %1680 = vmatpush.bf16.msra.mxu3 %v2980_v21  ;;  %v1432_v21 = vpop.f32.mrf.mxu2 }
  0xe5   :  { %1694 = vmatpush.bf16.msra.mxu2 %v3108_v22  ;;  %1709 = vmatmul.bf16.vlgmr.msra.gmra.mxu0 %v4378_v42  ;;  %v3395_v42 = vld [vmem:[#allocation10 + $0x30] sm:$0xf]  ;;  %v3380_v22 = vor.u32 %v3954_v17, %v3379_v16  ;;  %v3971_v16 = vld [vmem:[#allocation10 + $0xa4] sm:$0xf]  ;;  %v3453_v17 = vld [vmem:[#allocation10 + $0xa8] sm:$0xf0] }
  0xe6   :  { %v3396_v63 = vor.u32 %v3958_v58, %v3395_v42  ;;  %v1404_v9 = vpop.f32.mrf.mxu0  ;;  %v4415_v33 = vpop.f32.mrf.mxu3 }
  0xe7   :  { %2145 = vmatpush.bf16.msrb.mxu1 %v3492_v29  ;;  %1681 = vmatmul.bf16.vlgmr.msra.gmra.mxu3 %v4364_v60  ;;  %v3467_v60 = vld [vmem:[#allocation10 + $0xc0] sm:$0xf]  ;;  %v1418_v11 = vpop.f32.mrf.mxu1 }
  0xe8   :  { %2131 = vmatpush.bf16.msrb.mxu3 %v3428_v23  ;;  %1695 = vmatmul.bf16.vlgmr.msra.gmra.mxu2 %v4376_v37  ;;  %v1375_v37 = vadd.f32 %v4402_v7, %v1361_v45  ;;  %v3468_v59 = vor.u32 %v3976_v56, %v3467_v60  ;;  %v1405_v7 = vadd.f32 %v1404_v9, %v1391_v3  ;;  %v3443_v23 = vld [vmem:[#allocation10 + $0x90] sm:$0xf]  ;;  %v3979_v45 = vld [vmem:[#allocation10 + $0xe4] sm:$0xf]  ;;  %v3405_v56 = vld [vmem:[#allocation10 + $0x48] sm:$0xf0] }
  0xe9   :  { %v3444_v26 = vor.u32 %v3970_v55, %v3443_v23  ;;  %v3959_v60 = vld [vmem:[#allocation10 + $0x44] sm:$0xf]  ;;  %v3461_v3 = vld [vmem:[#allocation10 + $0xb8] sm:$0xf0]  ;;  %v3547_v23 = vld [vmem:[#allocation10 + $0x160] sm:$0xf] }
  0xea   :  { %v1389_v2 = vadd.f32 %v1388_v32, %v1375_v37  ;;  %v1419_v15 = vadd.f32 %v1418_v11, %v1405_v7  ;;  %v3968_v32 = vld [vmem:[#allocation10 + $0x84] sm:$0xf0]  ;;  %v3408_v58 = vor.u32 %v3959_v60, %v3405_v56  ;;  %v3555_v7 = vld [vmem:[#allocation10 + $0x170] sm:$0xf]  ;;  %v3998_v11 = vld [vmem:[#allocation10 + $0x174] sm:$0xf0] }
  0xeb   :  { %2146 = vmatpush.bf16.msrb.mxu1 %v3484_v40  ;;  %v3436_v35 = vor.u32 %v3968_v32, %v3435_v31  ;;  %v3421_v40 = vld [vmem:[#allocation10 + $0x68] sm:$0xf0]  ;;  %v3556_v13 = vor.u32 %v3998_v11, %v3555_v7  ;;  %v3996_v55 = vld [vmem:[#allocation10 + $0x164] sm:$0xf0]  ;;  %v3990_v60 = vld [vmem:[#allocation10 + $0x134] sm:$0xf0] }
  0xec   :  { %2132 = vmatpush.bf16.msrb.mxu3 %v3420_v8  ;;  %v1403_v10 = vadd.f32 %v1402_v51, %v1389_v2  ;;  %v1433_v24 = vadd.f32 %v1432_v21, %v1419_v15  ;;  %v3424_v44 = vor.u32 %v3963_v39, %v3421_v40  ;;  %v3416_v51 = vor.u32 %v3961_v47, %v3413_v48  ;;  %v1458_v57 = vpop.f32.mrf.mxu2  ;;  %v3973_v2 = vld [vmem:[#allocation10 + $0xb4] sm:$0xf]  ;;  %v3967_v40 = vld [vmem:[#allocation10 + $0x84] sm:$0xf]  ;;  %v3992_v47 = vld [vmem:[#allocation10 + $0x144] sm:$0xf0] }
  0xed   :  { %v3392_v15 = vor.u32 %v3955_v4, %v3389_v5  ;;  %2159 = vmatpush.bf16.msrb.mxu2 %v3556_v13  ;;  %v3456_v21 = vor.u32 %v3971_v16, %v3453_v17  ;;  %v3499_v11 = vld [vmem:[#allocation10 + $0x100] sm:$0xf]  ;;  %v3995_v17 = vld [vmem:[#allocation10 + $0x164] sm:$0xf] }
  0xee   :  { %v1417_v20 = vadd.f32 %v1416_v52, %v1403_v10  ;;  %v1733_v8 = vmax.f32 %v1433_v24, 0.0  ;;  %v3977_v52 = vld [vmem:[#allocation10 + $0xd4] sm:$0xf]  ;;  %v1446_v42 = vpop.f32.mrf.mxu3 }
  0xef   :  { %2147 = vmatpush.bf16.msrb.mxu1 %v3476_v49  ;;  %v3488_v49 = vor.u32 %v3979_v45, %v3485_v46  ;;  %v3531_v46 = vld [vmem:[#allocation10 + $0x140] sm:$0xf] }
  0xf0   :  { %2133 = vmatpush.bf16.msrb.mxu3 %v3412_v54  ;;  %v1431_v29 = vadd.f32 %v1430_v61, %v1417_v20  ;;  %v3957_v61 = vld [vmem:[#allocation10 + $0x34] sm:$0xf]  ;;  %v3381_v20 = vld [vmem:[#allocation10 + $0x18] sm:$0xf0] }
  0xf2   :  { %3368 = vmatmul.msk.bf16.vlgmr.msra.gmra.mxu1 %vm1333_vm0, %v4372_v50  ;;  %v3952_v50 = vld [vmem:[#allocation10 + $0x4] sm:$0xf0]  ;;  %v1729_v54 = vmax.f32 %v1431_v29, 0.0  ;;  %v3951_v29 = vld [vmem:[#allocation10 + $0x4] sm:$0xf] }
  0xf3   :  { %2148 = vmatpush.bf16.msrb.mxu1 %v3468_v59  ;;  %v3372_v30 = vor.u32 %v3952_v50, %v3371_v25  ;;  %v3975_v59 = vld [vmem:[#allocation10 + $0xc4] sm:$0xf]  ;;  %v3548_v25 = vor.u32 %v3996_v55, %v3547_v23  ;;  %v4014_v23 = vld [vmem:[#allocation10 + $0x1f4] sm:$0xf0] }
  0xf4   :  { %2134 = vmatpush.bf16.msrb.mxu3 %v3404_v53  ;;  %v4417_v43 = vpack.c.bf16 %v1733_v8, %v1729_v54  ;;  %v3477_v53 = vld [vmem:[#allocation10 + $0xd8] sm:$0xf0]  ;;  %v3472_v0 = vor.u32 %v3975_v59, %v3469_v62  ;;  %v1460_v14 = vpop.f32.mrf.mxu2  ;;  %v3539_v8 = vld [vmem:[#allocation10 + $0x150] sm:$0xf]  ;;  %v3515_v62 = vld [vmem:[#allocation10 + $0x120] sm:$0xf] }
  0xf5   :  { %v3480_v37 = vor.u32 %v3977_v52, %v3477_v53  ;;  %2160 = vmatpush.bf16.msrb.mxu2 %v3548_v25  ;;  %v3523_v53 = vld [vmem:[#allocation10 + $0x130] sm:$0xf]  ;;  %v3993_v25 = vld [vmem:[#allocation10 + $0x154] sm:$0xf] }
  0xf7   :  { %2149 = vmatpush.bf16.msrb.mxu1 %v3460_v6  ;;  %v3464_v6 = vor.u32 %v3973_v2, %v3461_v3  ;;  %v3986_v2 = vld [vmem:[#allocation10 + $0x114] sm:$0xf0] }
  0xf8   :  { %2135 = vmatpush.bf16.msrb.mxu3 %v3396_v63  ;;  %v3397_v63 = vld [vmem:[#allocation10 + $0x38] sm:$0xf0] }
  0xf9   :  { %v3400_v1 = vor.u32 %v3957_v61, %v3397_v63  ;;  %v3988_v61 = vld [vmem:[#allocation10 + $0x124] sm:$0xf0] }
  0xfb   :  { %2150 = vmatpush.bf16.msrb.mxu1 %v3452_v19  ;;  %v3953_v19 = vld [vmem:[#allocation10 + $0x14] sm:$0xf] }
  0xfc   :  { %2136 = vmatpush.bf16.msrb.mxu3 %v3388_v12  ;;  %v346_v12 = vperm.slane %v4404_v18, 1  ;;  %v3384_v50 = vor.u32 %v3953_v19, %v3381_v20  ;;  %v3549_v19 = vld [vmem:[#allocation10 + $0x168] sm:$0xf0] }
  0xfe   :  { %v1472_v9 = vpop.f32.mrf.mxu0  ;;  %v1445_v24 = vadd.f32 %v4415_v33, %v346_v12  ;;  %v1447_v28 = vadd.f32 %v1446_v42, %v346_v12 }
  0xff   :  { %2151 = vmatpush.bf16.msrb.mxu1 %v3444_v26  ;;  %v3969_v26 = vld [vmem:[#allocation10 + $0x94] sm:$0xf] }
 0x100   :  { %2137 = vmatpush.bf16.msrb.mxu3 %v3380_v22  ;;  %v1486_v22 = vpop.f32.mrf.mxu1  ;;  %v3448_v31 = vor.u32 %v3969_v26, %v3445_v27  ;;  %v1461_v54 = vadd.f32 %v1460_v14, %v1447_v28  ;;  %v3997_v14 = vld [vmem:[#allocation10 + $0x174] sm:$0xf]  ;;  %v3611_v27 = vld [vmem:[#allocation10 + $0x1e0] sm:$0xf]  ;;  %v4012_v28 = vld [vmem:[#allocation10 + $0x1e4] sm:$0xf0] }
 0x103   :  { %2152 = vmatpush.bf16.msrb.mxu1 %v3436_v35  ;;  %v1459_v35 = vadd.f32 %v1458_v57, %v1445_v24 }
 0x104   :  { %2138 = vmatpush.bf16.msrb.mxu3 %v3372_v30  ;;  %v3373_v30 = vld [vmem:[#allocation10 + $0x8] sm:$0xf0] }
 0x105   :  { %v3376_v33 = vor.u32 %v3951_v29, %v3373_v30  ;;  %v3612_v29 = vor.u32 %v4012_v28, %v3611_v27  ;;  %v3991_v30 = vld [vmem:[#allocation10 + $0x144] sm:$0xf] }
 0x106   :  { %v1500_v10 = vpop.f32.mrf.mxu3  ;;  %v1474_v38 = vpop.f32.mrf.mxu0 }
 0x107   :  { %2201 = vmatpush.bf16.msra.mxu1 %v3496_v41  ;;  %2139 = vmatmul.bf16.vlgmr.msrb.gmra.mxu3 %v4417_v43  ;;  %v3437_v41 = vld [vmem:[#allocation10 + $0x88] sm:$0xf0]  ;;  %v1475_v48 = vadd.f32 %v1474_v38, %v1461_v54  ;;  %v3595_v54 = vld [vmem:[#allocation10 + $0x1c0] sm:$0xf] }
 0x108   :  { %2187 = vmatpush.bf16.msra.mxu3 %v3432_v34  ;;  %v3994_v34 = vld [vmem:[#allocation10 + $0x154] sm:$0xf0]  ;;  %v3440_v45 = vor.u32 %v3967_v40, %v3437_v41  ;;  %v347_v40 = vperm.slane %v4404_v18, 2 }
 0x109   :  { %v3540_v36 = vor.u32 %v3994_v34, %v3539_v8  ;;  %v3603_v8 = vld [vmem:[#allocation10 + $0x1d0] sm:$0xf]  ;;  %v4010_v34 = vld [vmem:[#allocation10 + $0x1d4] sm:$0xf0] }
 0x10b   :  { %2202 = vmatpush.bf16.msra.mxu1 %v3488_v49  ;;  %v1514_v39 = vpop.f32.mrf.mxu2  ;;  %2161 = vmatpush.bf16.msrb.mxu2 %v3540_v36  ;;  %v3532_v49 = vor.u32 %v3992_v47, %v3531_v46  ;;  %v3604_v36 = vor.u32 %v4010_v34, %v3603_v8  ;;  %v3987_v47 = vld [vmem:[#allocation10 + $0x124] sm:$0xf]  ;;  %v3605_v8 = vld [vmem:[#allocation10 + $0x1d8] sm:$0xf0] }
 0x10c   :  { %2188 = vmatpush.bf16.msra.mxu3 %v3424_v44  ;;  %v1473_v44 = vadd.f32 %v1472_v9, %v1459_v35 }
 0x10e   :  { %v1502_v32 = vpop.f32.mrf.mxu3  ;;  %v1487_v52 = vadd.f32 %v1486_v22, %v1473_v44  ;;  %v3619_v22 = vld [vmem:[#allocation10 + $0x1f0] sm:$0xf]  ;;  %v4008_v44 = vld [vmem:[#allocation10 + $0x1c4] sm:$0xf0] }
 0x10f   :  { %2203 = vmatpush.bf16.msra.mxu1 %v3480_v37  ;;  %2162 = vmatpush.bf16.msrb.mxu2 %v3532_v49  ;;  %v3524_v37 = vor.u32 %v3990_v60, %v3523_v53  ;;  %v3620_v55 = vor.u32 %v4014_v23, %v3619_v22  ;;  %v3596_v46 = vor.u32 %v4008_v44, %v3595_v54  ;;  %v4006_v53 = vld [vmem:[#allocation10 + $0x1b4] sm:$0xf0]  ;;  %v3621_v22 = vld [vmem:[#allocation10 + $0x1f8] sm:$0xf0] }
 0x110   :  { %2189 = vmatpush.bf16.msra.mxu3 %v3416_v51  ;;  %v1488_v51 = vpop.f32.mrf.mxu1  ;;  %v1501_v57 = vadd.f32 %v1500_v10, %v1487_v52  ;;  %v3587_v52 = vld [vmem:[#allocation10 + $0x1b0] sm:$0xf] }
 0x111   :  { %v1489_v42 = vadd.f32 %v1488_v51, %v1475_v48  ;;  %2173 = vmatpush.bf16.msrb.mxu0 %v3620_v55  ;;  %v3517_v48 = vld [vmem:[#allocation10 + $0x128] sm:$0xf0]  ;;  %v3588_v60 = vor.u32 %v4006_v53, %v3587_v52 }
 0x112   :  { %v1515_v63 = vadd.f32 %v1514_v39, %v1501_v57  ;;  %v3989_v39 = vld [vmem:[#allocation10 + $0x134] sm:$0xf]  ;;  %v3520_v51 = vor.u32 %v3987_v47, %v3517_v48  ;;  %v3589_v47 = vld [vmem:[#allocation10 + $0x1b8] sm:$0xf0] }
 0x113   :  { %2204 = vmatpush.bf16.msra.mxu1 %v3472_v0  ;;  %2163 = vmatpush.bf16.msrb.mxu2 %v3524_v37  ;;  %v1516_v59 = vpop.f32.mrf.mxu2  ;;  %v3516_v0 = vor.u32 %v3988_v61, %v3515_v62 }
 0x114   :  { %2190 = vmatpush.bf16.msra.mxu3 %v3408_v58  ;;  %v1503_v58 = vadd.f32 %v1502_v32, %v1489_v42  ;;  %v3985_v42 = vld [vmem:[#allocation10 + $0x114] sm:$0xf] }
 0x115   :  { %2174 = vmatpush.bf16.msrb.mxu0 %v3612_v29 }
 0x116   :  { %v1528_v56 = vpop.f32.mrf.mxu3  ;;  %v1517_v3 = vadd.f32 %v1516_v59, %v1503_v58  ;;  %v3509_v58 = vld [vmem:[#allocation10 + $0x118] sm:$0xf0] }
 0x117   :  { %2205 = vmatpush.bf16.msra.mxu1 %v3464_v6  ;;  %v1529_v4 = vadd.f32 %v1528_v56, %v1515_v63  ;;  %2164 = vmatpush.bf16.msrb.mxu2 %v3516_v0  ;;  %v3512_v61 = vor.u32 %v3985_v42, %v3509_v58  ;;  %v3579_v63 = vld [vmem:[#allocation10 + $0x1a0] sm:$0xf]  ;;  %v4004_v0 = vld [vmem:[#allocation10 + $0x1a4] sm:$0xf0]  ;;  %v4001_v42 = vld [vmem:[#allocation10 + $0x194] sm:$0xf] }
 0x118   :  { %2191 = vmatpush.bf16.msra.mxu3 %v3400_v1  ;;  %v3507_v1 = vld [vmem:[#allocation10 + $0x110] sm:$0xf]  ;;  %v3573_v58 = vld [vmem:[#allocation10 + $0x198] sm:$0xf0] }
 0x119   :  { %v3508_v5 = vor.u32 %v3986_v2, %v3507_v1  ;;  %v1730_v7 = vmax.f32 %v1529_v4, 0.0  ;;  %2175 = vmatpush.bf16.msrb.mxu0 %v3604_v36  ;;  %v3580_v2 = vor.u32 %v4004_v0, %v3579_v63  ;;  %v3501_v4 = vld [vmem:[#allocation10 + $0x108] sm:$0xf0] }
 0x11b   :  { %2206 = vmatpush.bf16.msra.mxu1 %v3456_v21  ;;  %2165 = vmatpush.bf16.msrb.mxu2 %v3508_v5  ;;  %v3552_v21 = vor.u32 %v3995_v17, %v3549_v19 }
 0x11c   :  { %2192 = vmatpush.bf16.msra.mxu3 %v3392_v15  ;;  %v3557_v15 = vld [vmem:[#allocation10 + $0x178] sm:$0xf0] }
 0x11d   :  { %v3560_v16 = vor.u32 %v3997_v14, %v3557_v15  ;;  %2176 = vmatpush.bf16.msrb.mxu0 %v3596_v46  ;;  %v3563_v15 = vld [vmem:[#allocation10 + $0x180] sm:$0xf]  ;;  %v4005_v46 = vld [vmem:[#allocation10 + $0x1b4] sm:$0xf] }
 0x11e   :  { %v1530_v6 = vpop.f32.mrf.mxu3  ;;  %v1570_v20 = vpop.f32.mrf.mxu0  ;;  %v3592_v48 = vor.u32 %v4005_v46, %v3589_v47  ;;  %v3651_v47 = vld [vmem:[#allocation11 + $0x30] sm:$0xf] }
 0x11f   :  { %2207 = vmatpush.bf16.msra.mxu1 %v3448_v31  ;;  %v1531_v9 = vadd.f32 %v1530_v6, %v1517_v3  ;;  %v1542_v24 = vpop.f32.mrf.mxu1  ;;  %v3533_v31 = vld [vmem:[#allocation10 + $0x148] sm:$0xf0]  ;;  %v3983_v3 = vld [vmem:[#allocation10 + $0x104] sm:$0xf] }
 0x120   :  { %2193 = vmatpush.bf16.msra.mxu3 %v3384_v50  ;;  %v3541_v50 = vld [vmem:[#allocation10 + $0x158] sm:$0xf0]  ;;  %v3536_v32 = vor.u32 %v3991_v30, %v3533_v31  ;;  %v1543_v49 = vadd.f32 %v1542_v24, %v347_v40 }
 0x121   :  { %v1734_v10 = vmax.f32 %v1531_v9, 0.0  ;;  %v3544_v26 = vor.u32 %v3993_v25, %v3541_v50  ;;  %2177 = vmatpush.bf16.msrb.mxu0 %v3588_v60  ;;  %v3504_v9 = vor.u32 %v3983_v3, %v3501_v4  ;;  %v4011_v50 = vld [vmem:[#allocation10 + $0x1e4] sm:$0xf] }
 0x123   :  { %2208 = vmatpush.bf16.msra.mxu1 %v3440_v45  ;;  %v1738_v12 = vpack.c.bf16 %v1734_v10, %v1730_v7  ;;  %v3571_v7 = vld [vmem:[#allocation10 + $0x190] sm:$0xf]  ;;  %v4002_v10 = vld [vmem:[#allocation10 + $0x194] sm:$0xf0] }
 0x124   :  { %2194 = vmatpush.bf16.msra.mxu3 %v3376_v33  ;;  %v3525_v33 = vld [vmem:[#allocation10 + $0x138] sm:$0xf0] }
 0x125   :  { %2153 = vmatmul.bf16.vlgmr.msrb.gmra.mxu1 %v1738_v12  ;;  %v3528_v41 = vor.u32 %v3989_v39, %v3525_v33  ;;  %2178 = vmatpush.bf16.msrb.mxu0 %v3580_v2 }
 0x126   :  { %v1572_v38 = vpop.f32.mrf.mxu0 }
 0x127   :  { %2195 = vmatmul.bf16.vlgmr.msra.gmra.mxu3 %v4417_v43  ;;  %v3984_v43 = vld [vmem:[#allocation10 + $0x104] sm:$0xf0]  ;;  %v1544_v45 = vpop.f32.mrf.mxu1 }
 0x128   :  { %v3500_v13 = vor.u32 %v3984_v43, %v3499_v11  ;;  %v1545_v62 = vadd.f32 %v1544_v45, %v347_v40  ;;  %v3572_v11 = vor.u32 %v4002_v10, %v3571_v7  ;;  %v4007_v40 = vld [vmem:[#allocation10 + $0x1c4] sm:$0xf]  ;;  %v348_v45 = vperm.slane %v4404_v18, 3  ;;  %v3565_v18 = vld [vmem:[#allocation10 + $0x188] sm:$0xf0] }
 0x12a   :  { %2166 = vmatpush.bf16.msrb.mxu2 %v3500_v13  ;;  %v1556_v35 = vpop.f32.mrf.mxu3  ;;  %2179 = vmatpush.bf16.msrb.mxu0 %v3572_v11 }
 0x12b   :  { %v1584_v37 = vpop.f32.mrf.mxu2  ;;  %v1557_v59 = vadd.f32 %v1556_v35, %v1543_v49  ;;  %v4003_v49 = vld [vmem:[#allocation10 + $0x1a4] sm:$0xf] }
 0x12d   :  { %v1571_v5 = vadd.f32 %v1570_v20, %v1557_v59  ;;  %v3576_v59 = vor.u32 %v4001_v42, %v3573_v58  ;;  %v3749_v42 = vld [vmem:[#allocation11 + $0xf8] sm:$0xf0] }
 0x12e   :  { %2215 = vmatpush.bf16.msra.mxu2 %v3560_v16  ;;  %v1626_v56 = vpop.f32.mrf.mxu0  ;;  %v4000_v16 = vld [vmem:[#allocation10 + $0x184] sm:$0xf0] }
 0x12f   :  { %v3564_v19 = vor.u32 %v4000_v16, %v3563_v15 }
 0x131   :  { %2180 = vmatpush.bf16.msrb.mxu0 %v3564_v19 }
 0x132   :  { %2216 = vmatpush.bf16.msra.mxu2 %v3552_v21  ;;  %v1558_v57 = vpop.f32.mrf.mxu3  ;;  %v4013_v21 = vld [vmem:[#allocation10 + $0x1f4] sm:$0xf] }
 0x133   :  { %v1559_v6 = vadd.f32 %v1558_v57, %v1545_v62  ;;  %v1586_v17 = vpop.f32.mrf.mxu2  ;;  %v3624_v55 = vor.u32 %v4013_v21, %v3621_v22  ;;  %v3999_v62 = vld [vmem:[#allocation10 + $0x184] sm:$0xf] }
 0x135   :  { %2209 = vmatmul.bf16.vlgmr.msra.gmra.mxu1 %v1738_v12  ;;  %v1585_v12 = vadd.f32 %v1584_v37, %v1571_v5  ;;  %v1573_v13 = vadd.f32 %v1572_v38, %v1559_v6  ;;  %2229 = vmatpush.bf16.msra.mxu0 %v3624_v55 }
 0x136   :  { %2217 = vmatpush.bf16.msra.mxu2 %v3544_v26  ;;  %v1628_v14 = vpop.f32.mrf.mxu0  ;;  %v3613_v26 = vld [vmem:[#allocation10 + $0x1e8] sm:$0xf0] }
 0x137   :  { %v1587_v24 = vadd.f32 %v1586_v17, %v1573_v13  ;;  %v3616_v28 = vor.u32 %v4011_v50, %v3613_v26  ;;  %v3685_v26 = vld [vmem:[#allocation11 + $0x78] sm:$0xf0] }
 0x139   :  { %2230 = vmatpush.bf16.msra.mxu0 %v3616_v28  ;;  %v3675_v28 = vld [vmem:[#allocation11 + $0x60] sm:$0xf] }
 0x13a   :  { %2218 = vmatpush.bf16.msra.mxu2 %v3536_v32  ;;  %v4009_v32 = vld [vmem:[#allocation10 + $0x1d4] sm:$0xf] }
 0x13b   :  { %v3608_v36 = vor.u32 %v4009_v32, %v3605_v8  ;;  %v3677_v32 = vld [vmem:[#allocation11 + $0x68] sm:$0xf0] }
 0x13d   :  { %2231 = vmatpush.bf16.msra.mxu0 %v3608_v36  ;;  %v4025_v36 = vld [vmem:[#allocation11 + $0x54] sm:$0xf] }
 0x13e   :  { %2219 = vmatpush.bf16.msra.mxu2 %v3528_v41  ;;  %v3597_v41 = vld [vmem:[#allocation10 + $0x1c8] sm:$0xf0] }
 0x13f   :  { %v1598_v1 = vpop.f32.mrf.mxu1  ;;  %v3600_v44 = vor.u32 %v4007_v40, %v3597_v41  ;;  %v3659_v40 = vld [vmem:[#allocation11 + $0x40] sm:$0xf]  ;;  %v4024_v41 = vld [vmem:[#allocation11 + $0x44] sm:$0xf0] }
 0x140   :  { %v1599_v23 = vadd.f32 %v1598_v1, %v1585_v12  ;;  %v3568_v1 = vor.u32 %v3999_v62, %v3565_v18  ;;  %v4020_v62 = vld [vmem:[#allocation11 + $0x24] sm:$0xf0]  ;;  %v3739_v18 = vld [vmem:[#allocation11 + $0xe0] sm:$0xf] }
 0x141   :  { %2232 = vmatpush.bf16.msra.mxu0 %v3600_v44  ;;  %v3660_v44 = vor.u32 %v4024_v41, %v3659_v40  ;;  %v3709_v40 = vld [vmem:[#allocation11 + $0xa8] sm:$0xf0] }
 0x142   :  { %2220 = vmatpush.bf16.msra.mxu2 %v3520_v51  ;;  %v1654_v35 = vpop.f32.mrf.mxu0  ;;  %v3581_v51 = vld [vmem:[#allocation10 + $0x1a8] sm:$0xf0] }
 0x145   :  { %2233 = vmatpush.bf16.msra.mxu0 %v3592_v48  ;;  %v4022_v48 = vld [vmem:[#allocation11 + $0x34] sm:$0xf0] }
 0x146   :  { %2221 = vmatpush.bf16.msra.mxu2 %v3512_v61 }
 0x147   :  { %v1600_v20 = vpop.f32.mrf.mxu1 }
 0x148   :  { %v1601_v27 = vadd.f32 %v1600_v20, %v1587_v24  ;;  %v3683_v20 = vld [vmem:[#allocation11 + $0x70] sm:$0xf]  ;;  %v4030_v24 = vld [vmem:[#allocation11 + $0x74] sm:$0xf0] }
 0x149   :  { %v3684_v50 = vor.u32 %v4030_v24, %v3683_v20  ;;  %v4040_v20 = vld [vmem:[#allocation11 + $0xc4] sm:$0xf0]  ;;  %v4015_v24 = vld [vmem:[#allocation11 + $0x4] sm:$0xf] }
 0x14a   :  { %2222 = vmatpush.bf16.msra.mxu2 %v3504_v9  ;;  %v1612_v43 = vpop.f32.mrf.mxu3  ;;  %v1656_v60 = vpop.f32.mrf.mxu0 }
 0x14b   :  { %v1613_v25 = vadd.f32 %v1612_v43, %v1599_v23  ;;  %v1640_v38 = vpop.f32.mrf.mxu2  ;;  %2447 = vmatpush.bf16.msrb.mxu3 %v3684_v50 }
 0x14c   :  { %v1641_v53 = vadd.f32 %v1640_v38, %v348_v45 }
 0x14d   :  { %v1627_v30 = vadd.f32 %v1626_v56, %v1613_v25  ;;  %v3584_v56 = vor.u32 %v4003_v49, %v3581_v51  ;;  %v4029_v25 = vld [vmem:[#allocation11 + $0x74] sm:$0xf]  ;;  %v3747_v49 = vld [vmem:[#allocation11 + $0xf0] sm:$0xf]  ;;  %v3652_v51 = vor.u32 %v4022_v48, %v3651_v47  ;;  %v4034_v47 = vld [vmem:[#allocation11 + $0x94] sm:$0xf0] }
 0x14e   :  { %v1655_v57 = vadd.f32 %v1654_v35, %v1641_v53  ;;  %v4026_v35 = vld [vmem:[#allocation11 + $0x54] sm:$0xf0]  ;;  %v4021_v53 = vld [vmem:[#allocation11 + $0x34] sm:$0xf] }
 0x14f   :  { %v1731_v39 = vmax.f32 %v1627_v30, 0.0  ;;  %2234 = vmatpush.bf16.msra.mxu0 %v3584_v56  ;;  %v4027_v30 = vld [vmem:[#allocation11 + $0x64] sm:$0xf]  ;;  %v4033_v48 = vld [vmem:[#allocation11 + $0x94] sm:$0xf] }
 0x150   :  { %v3680_v8 = vor.u32 %v4027_v30, %v3677_v32  ;;  %v3715_v30 = vld [vmem:[#allocation11 + $0xb0] sm:$0xf]  ;;  %v4037_v32 = vld [vmem:[#allocation11 + $0xb4] sm:$0xf] }
 0x152   :  { %v1614_v29 = vpop.f32.mrf.mxu3 }
 0x153   :  { %v1615_v31 = vadd.f32 %v1614_v29, %v1601_v27  ;;  %v1642_v37 = vpop.f32.mrf.mxu2  ;;  %2235 = vmatpush.bf16.msra.mxu0 %v3576_v59  ;;  %v3688_v27 = vor.u32 %v4029_v25, %v3685_v26  ;;  %v4028_v29 = vld [vmem:[#allocation11 + $0x64] sm:$0xf0]  ;;  %v3643_v59 = vld [vmem:[#allocation11 + $0x20] sm:$0xf]  ;;  %v3629_v25 = vld [vmem:[#allocation11 + $0x8] sm:$0xf0] }
 0x154   :  { %v1643_v2 = vadd.f32 %v1642_v37, %v348_v45  ;;  %v3661_v45 = vld [vmem:[#allocation11 + $0x48] sm:$0xf0]  ;;  %v3632_v26 = vor.u32 %v4015_v24, %v3629_v25 }
 0x155   :  { %v1629_v34 = vadd.f32 %v1628_v14, %v1615_v31  ;;  %v3676_v31 = vor.u32 %v4028_v29, %v3675_v28  ;;  %v3725_v28 = vld [vmem:[#allocation11 + $0xc8] sm:$0xf0] }
 0x156   :  { %v1657_v6 = vadd.f32 %v1656_v60, %v1643_v2  ;;  %v3653_v60 = vld [vmem:[#allocation11 + $0x38] sm:$0xf0] }
 0x157   :  { %v1735_v33 = vmax.f32 %v1629_v34, 0.0  ;;  %2236 = vmatpush.bf16.msra.mxu0 %v3568_v1  ;;  %2448 = vmatpush.bf16.msrb.mxu3 %v3676_v31  ;;  %v3667_v34 = vld [vmem:[#allocation11 + $0x50] sm:$0xf]  ;;  %v3656_v37 = vor.u32 %v4021_v53, %v3653_v60  ;;  %v3645_v1 = vld [vmem:[#allocation11 + $0x28] sm:$0xf0] }
 0x158   :  { %v3668_v38 = vor.u32 %v4026_v35, %v3667_v34  ;;  %v4038_v31 = vld [vmem:[#allocation11 + $0xb4] sm:$0xf0]  ;;  %v3717_v34 = vld [vmem:[#allocation11 + $0xb8] sm:$0xf0]  ;;  %v3691_v60 = vld [vmem:[#allocation11 + $0x80] sm:$0xf] }
 0x159   :  { %v1739_v54 = vpack.c.bf16 %v1735_v33, %v1731_v39  ;;  %v3669_v39 = vld [vmem:[#allocation11 + $0x58] sm:$0xf0]  ;;  %v3720_v35 = vor.u32 %v4037_v32, %v3717_v34 }
 0x15a   :  { %v3672_v33 = vor.u32 %v4025_v36, %v3669_v39  ;;  %v3707_v36 = vld [vmem:[#allocation11 + $0xa0] sm:$0xf]  ;;  %v4035_v39 = vld [vmem:[#allocation11 + $0xa4] sm:$0xf]  ;;  %v1805_v53 = vld [vmem:[%s4445_s5] sm:$0x3] }
 0x15b   :  { %2167 = vmatmul.bf16.vlgmr.msrb.gmra.mxu2 %v1739_v54  ;;  %2449 = vmatpush.bf16.msrb.mxu3 %v3668_v38  ;;  %v4036_v38 = vld [vmem:[#allocation11 + $0xa4] sm:$0xf0] }
 0x15c   :  { %2475 = vmatpush.bf16.msrb.mxu2 %v3688_v27  ;;  %v4039_v27 = vld [vmem:[#allocation11 + $0xc4] sm:$0xf] }
 0x15d   :  { %v3728_v29 = vor.u32 %v4039_v27, %v3725_v28 }
 0x15f   :  { %v1668_v52 = vpop.f32.mrf.mxu1  ;;  %2450 = vmatpush.bf16.msrb.mxu3 %v3660_v44  ;;  %v3712_v44 = vor.u32 %v4035_v39, %v3709_v40 }
 0x160   :  { %v1669_v63 = vadd.f32 %v1668_v52, %v1655_v57  ;;  %2476 = vmatpush.bf16.msrb.mxu2 %v3680_v8  ;;  %v4046_v52 = vld [vmem:[#allocation11 + $0xf4] sm:$0xf0]  ;;  %v4045_v57 = vld [vmem:[#allocation11 + $0xf4] sm:$0xf]  ;;  %v3716_v8 = vor.u32 %v4038_v31, %v3715_v30  ;;  %v2281_v31 = vld [vmem:[%s4447_s7] sm:$0x3] }
 0x161   :  { %v3748_v56 = vor.u32 %v4046_v52, %v3747_v49  ;;  %v3752_v58 = vor.u32 %v4045_v57, %v3749_v42  ;;  %v3693_v42 = vld [vmem:[#allocation11 + $0x88] sm:$0xf0]  ;;  %v2283_v40 = vperm.slane %v2281_v31, 0  ;;  %s4281_s7 = smov [#allocation13]  }
 0x162   :  { %v1710_v4 = vpop.f32.mrf.mxu0  ;;  %s2547_s22 = sshll.u32 %s4281_s7, 4  ;;  %s2548_s22 = int_to_ptr.vmem [resolvable:$true] %s2547_s22 }
 0x163   :  { %2451 = vmatpush.bf16.msrb.mxu3 %v3652_v51  ;;  %2461 = vmatpush.bf16.msrb.mxu1 %v3748_v56  ;;  %v3701_v51 = vld [vmem:[#allocation11 + $0x98] sm:$0xf0]  ;;  %v4032_v56 = vld [vmem:[#allocation11 + $0x84] sm:$0xf0] }
 0x164   :  { %2477 = vmatpush.bf16.msrb.mxu2 %v3672_v33  ;;  %v3708_v33 = vor.u32 %v4036_v38, %v3707_v36  ;;  %v3704_v52 = vor.u32 %v4033_v48, %v3701_v51  ;;  %v3692_v57 = vor.u32 %v4032_v56, %v3691_v60 }
 0x167   :  { %v1670_v61 = vpop.f32.mrf.mxu1 }
 0x168   :  { %v1671_v7 = vadd.f32 %v1670_v61, %v1657_v6  ;;  %v3644_v61 = vor.u32 %v4020_v62, %v3643_v59  ;;  %v1807_v59 = vperm.slane %v1805_v53, 0 }
 0x16a   :  { %v1682_v0 = vpop.f32.mrf.mxu3  ;;  %v1712_v15 = vpop.f32.mrf.mxu0  ;;  %2452 = vmatpush.bf16.msrb.mxu3 %v3644_v61 }
 0x16b   :  { %v1696_v3 = vpop.f32.mrf.mxu2  ;;  %v1683_v5 = vadd.f32 %v1682_v0, %v1669_v63  ;;  %2223 = vmatmul.bf16.vlgmr.msra.gmra.mxu2 %v1739_v54  ;;  %v4023_v54 = vld [vmem:[#allocation11 + $0x44] sm:$0xf]  ;;  %v4044_v63 = vld [vmem:[#allocation11 + $0xe4] sm:$0xf0] }
 0x16c   :  { %v3664_v46 = vor.u32 %v4023_v54, %v3661_v45  ;;  %v4019_v0 = vld [vmem:[#allocation11 + $0x24] sm:$0xf]  ;;  %v3740_v2 = vor.u32 %v4044_v63, %v3739_v18 }
 0x16d   :  { %v1697_v9 = vadd.f32 %v1696_v3, %v1683_v5  ;;  %v3648_v3 = vor.u32 %v4019_v0, %v3645_v1  ;;  %v3741_v5 = vld [vmem:[#allocation11 + $0xe8] sm:$0xf0] }
 0x16e   :  { %2478 = vmatpush.bf16.msrb.mxu2 %v3664_v46  ;;  %2462 = vmatpush.bf16.msrb.mxu1 %v3740_v2  ;;  %v3699_v46 = vld [vmem:[#allocation11 + $0x90] sm:$0xf] }
 0x16f   :  { %v1724_v10 = vpop.f32.mrf.mxu1  ;;  %v1711_v12 = vadd.f32 %v1710_v4, %v1697_v9  ;;  %v4043_v4 = vld [vmem:[#allocation11 + $0xe4] sm:$0xf]  ;;  %v3635_v9 = vld [vmem:[#allocation11 + $0x10] sm:$0xf]  ;;  %v3700_v49 = vor.u32 %v4034_v47, %v3699_v46 }
 0x170   :  { %v3744_v6 = vor.u32 %v4043_v4, %v3741_v5  ;;  %v2507_v47 = vld [vmem:[#allocation5] sm:$0xff] }
 0x171   :  { %v1725_v17 = vadd.f32 %v1724_v10, %v1711_v12  ;;  %v3731_v10 = vld [vmem:[#allocation11 + $0xd0] sm:$0xf]  ;;  %v4017_v12 = vld [vmem:[#allocation11 + $0x14] sm:$0xf] }
 0x172   :  { %v1684_v11 = vpop.f32.mrf.mxu3  ;;  %2479 = vmatpush.bf16.msrb.mxu2 %v3656_v37  ;;  %v4031_v37 = vld [vmem:[#allocation11 + $0x84] sm:$0xf] }
 0x173   :  { %v1685_v43 = vadd.f32 %v1684_v11, %v1671_v7  ;;  %v1698_v13 = vpop.f32.mrf.mxu2  ;;  %v1732_v22 = vmax.f32 %v1725_v17, 0.0  ;;  %v4018_v7 = vld [vmem:[#allocation11 + $0x14] sm:$0xf0]  ;;  %v3733_v17 = vld [vmem:[#allocation11 + $0xd8] sm:$0xf0] }
 0x174   :  { %v3636_v11 = vor.u32 %v4018_v7, %v3635_v9 }
 0x175   :  { %v1699_v14 = vadd.f32 %v1698_v13, %v1685_v43  ;;  %v4042_v43 = vld [vmem:[#allocation11 + $0xd4] sm:$0xf0]  ;;  %v3637_v13 = vld [vmem:[#allocation11 + $0x18] sm:$0xf0] }
 0x176   :  { %2480 = vmatpush.bf16.msrb.mxu2 %v3648_v3  ;;  %2453 = vmatpush.bf16.msrb.mxu3 %v3636_v11 }
 0x177   :  { %v1713_v16 = vadd.f32 %v1712_v15, %v1699_v14  ;;  %v1726_v19 = vpop.f32.mrf.mxu1  ;;  %v3732_v14 = vor.u32 %v4042_v43, %v3731_v10  ;;  %v3640_v15 = vor.u32 %v4017_v12, %v3637_v13 }
 0x179   :  { %v1727_v21 = vadd.f32 %v1726_v19, %v1713_v16  ;;  %v4041_v16 = vld [vmem:[#allocation11 + $0xd4] sm:$0xf]  ;;  %2463 = vmatpush.bf16.msrb.mxu1 %v3732_v14  ;;  %v1808_v14 = vperm.slane %v1805_v53, 1 }
 0x17a   :  { %v3736_v19 = vor.u32 %v4041_v16, %v3733_v17  ;;  %2481 = vmatpush.bf16.msrb.mxu2 %v3640_v15 }
 0x17b   :  { %v1736_v23 = vmax.f32 %v1727_v21, 0.0  ;;  %v3627_v21 = vld [vmem:[#allocation11] sm:$0xf] }
 0x17d   :  { %v1740_v55 = vpack.c.bf16 %v1736_v23, %v1732_v22  ;;  %v4016_v22 = vld [vmem:[#allocation11 + $0x4] sm:$0xf0]  ;;  %v3723_v23 = vld [vmem:[#allocation11 + $0xc0] sm:$0xf] }
 0x17e   :  { %v3724_v50 = vor.u32 %v4040_v20, %v3723_v23  ;;  %2482 = vmatpush.bf16.msrb.mxu2 %v3632_v26 }
 0x17f   :  { %2181 = vmatmul.bf16.vlgmr.msrb.gmra.mxu0 %v1740_v55 }
 0x180   :  { %2489 = vmatpush.bf16.msrb.mxu0 %v3752_v58  ;;  %2464 = vmatpush.bf16.msrb.mxu1 %v3724_v50  ;;  %v3696_v58 = vor.u32 %v4031_v37, %v3693_v42 }
 0x184   :  { %2490 = vmatpush.bf16.msrb.mxu0 %v3744_v6  ;;  %2465 = vmatpush.bf16.msrb.mxu1 %v3716_v8  ;;  %v2284_v8 = vperm.slane %v2281_v31, 1 }
 0x188   :  { %2491 = vmatpush.bf16.msrb.mxu0 %v3736_v19  ;;  %2466 = vmatpush.bf16.msrb.mxu1 %v3708_v33 }
 0x18a   :  { %v2140_v41 = vpop.f32.mrf.mxu3 }
 0x18b   :  { %v2141_v0 = vadd.f32 %v2140_v41, %v1807_v59 }
 0x18c   :  { %2492 = vmatpush.bf16.msrb.mxu0 %v3728_v29  ;;  %2467 = vmatpush.bf16.msrb.mxu1 %v3700_v49 }
 0x18f   :  { %2237 = vmatmul.bf16.vlgmr.msra.gmra.mxu0 %v1740_v55  ;;  %v3628_v55 = vor.u32 %v4016_v22, %v3627_v21 }
 0x190   :  { %2493 = vmatpush.bf16.msrb.mxu0 %v3720_v35  ;;  %2468 = vmatpush.bf16.msrb.mxu1 %v3692_v57 }
 0x191   :  { %2454 = vmatpush.bf16.msrb.mxu3 %v3628_v55 }
 0x192   :  { %v2142_v62 = vpop.f32.mrf.mxu3 }
 0x193   :  { %v2143_v1 = vadd.f32 %v2142_v62, %v1807_v59  ;;  %v2515_v62 = vlaneseq }
 0x194   :  { %2494 = vmatpush.bf16.msrb.mxu0 %v3712_v44 }
 0x198   :  { %2495 = vmatpush.bf16.msrb.mxu0 %v3704_v52 }
 0x19c   :  { %2496 = vmatpush.bf16.msrb.mxu0 %v3696_v58 }
 0x1a2   :  { %v2154_v54 = vpop.f32.mrf.mxu1 }
 0x1a3   :  { %v2155_v2 = vadd.f32 %v2154_v54, %v2141_v0 }
 0x1aa   :  { %v2156_v18 = vpop.f32.mrf.mxu1  ;;  %v2196_v5 = vpop.f32.mrf.mxu3 }
 0x1ab   :  { %v2157_v3 = vadd.f32 %v2156_v18, %v2143_v1  ;;  %v2197_v19 = vadd.f32 %v2196_v5, %v1808_v14  ;;  %v2508_v18 = vld [vmem:[#allocation5 + $0x8] sm:$0xff] }
 0x1b2   :  { %v2210_v7 = vpop.f32.mrf.mxu1  ;;  %v2198_v16 = vpop.f32.mrf.mxu3 }
 0x1b3   :  { %v2199_v22 = vadd.f32 %v2198_v16, %v1808_v14  ;;  %v2211_v23 = vadd.f32 %v2210_v7, %v2197_v19 }
 0x1ba   :  { %v2212_v21 = vpop.f32.mrf.mxu1 }
 0x1bb   :  { %v2213_v20 = vadd.f32 %v2212_v21, %v2199_v22 }
 0x1de   :  { %v2168_v45 = vpop.f32.mrf.mxu2 }
 0x1df   :  { %v2169_v4 = vadd.f32 %v2168_v45, %v2155_v2 }
 0x1e6   :  { %v2170_v61 = vpop.f32.mrf.mxu2 }
 0x1e7   :  { %v2171_v6 = vadd.f32 %v2170_v61, %v2157_v3  ;;  %v2516_v3 = vand.u32 127, %v2515_v62 }
 0x1e9   :  { %vm2524_vm1 = vcmp.lt.s32.totalorder %v2516_v3, 32 }
 0x1ee   :  { %v2224_v43 = vpop.f32.mrf.mxu2 }
 0x1ef   :  { %v2225_v24 = vadd.f32 %v2224_v43, %v2211_v23 }
 0x1f6   :  { %v2226_v55 = vpop.f32.mrf.mxu2 }
 0x1f7   :  { %v2227_v25 = vadd.f32 %v2226_v55, %v2213_v20 }
 0x1fc   :  { %v2182_v63 = vpop.f32.mrf.mxu0 }
 0x1fd   :  { %v2183_v9 = vadd.f32 %v2182_v63, %v2169_v4 }
 0x1ff   :  { %v2243_v12 = vmax.f32 %v2183_v9, 0.0 }
 0x204   :  { %v2184_v10 = vpop.f32.mrf.mxu0 }
 0x205   :  { %v2185_v11 = vadd.f32 %v2184_v10, %v2171_v6 }
 0x207   :  { %v2245_v13 = vmax.f32 %v2185_v11, 0.0 }
 0x209   :  { %v2247_v15 = vpack.c.bf16 %v2245_v13, %v2243_v12 }
 0x20b   :  { %2455 = vmatmul.bf16.vlgmr.msrb.gmra.mxu3 %v2247_v15  ;;  %2483 = vmatmul.bf16.vlgmr.msrb.gmra.mxu2 %v2247_v15 }
 0x20c   :  { %v2238_v17 = vpop.f32.mrf.mxu0 }
 0x20d   :  { %v2239_v50 = vadd.f32 %v2238_v17, %v2225_v24 }
 0x20f   :  { %v2244_v28 = vmax.f32 %v2239_v50, 0.0 }
 0x214   :  { %v2240_v26 = vpop.f32.mrf.mxu0 }
 0x215   :  { %v2241_v27 = vadd.f32 %v2240_v26, %v2227_v25 }
 0x217   :  { %v2246_v29 = vmax.f32 %v2241_v27, 0.0 }
 0x219   :  { %v2248_v30 = vpack.c.bf16 %v2246_v29, %v2244_v28 }
 0x21b   :  { %2469 = vmatmul.bf16.vlgmr.msrb.gmra.mxu1 %v2248_v30  ;;  %2497 = vmatmul.bf16.vlgmr.msrb.gmra.mxu0 %v2248_v30 }
 0x28e   :  { %v2484_v32 = vpop.f32.mrf.mxu2  ;;  %v2456_v36 = vpop.f32.mrf.mxu3 }
 0x28f   :  { %v2485_v34 = vadd.f32 %v2484_v32, %v2284_v8  ;;  %v2457_v44 = vadd.f32 %v2456_v36, %v2283_v40 }
 0x296   :  { %v2486_v41 = vpop.f32.mrf.mxu2  ;;  %v2458_v51 = vpop.f32.mrf.mxu3 }
 0x297   :  { %v2487_v54 = vadd.f32 %v2486_v41, %v2284_v8  ;;  %v2459_v37 = vadd.f32 %v2458_v51, %v2283_v40 }
 0x298   :  { %v2498_v35 = vpop.f32.mrf.mxu0  ;;  %v2470_v39 = vpop.f32.mrf.mxu1 }
 0x299   :  { %v2499_v38 = vadd.f32 %v2498_v35, %v2485_v34  ;;  %v2471_v48 = vadd.f32 %v2470_v39, %v2457_v44 }
 0x29b   :  { %v2503_v33 = vmul.f32 1.442695, %v2499_v38  ;;  %v2531_v57 = vmul.f32 %v2471_v48, %v2471_v48 }
 0x29d   :  { %4061 = vpow2.f32 %v2503_v33 }
 0x2a0   :  { %v2500_v45 = vpop.f32.mrf.mxu0  ;;  %v2472_v56 = vpop.f32.mrf.mxu1 }
 0x2a1   :  { %v2501_v46 = vadd.f32 %v2500_v45, %v2487_v54  ;;  %v2473_v59 = vadd.f32 %v2472_v56, %v2459_v37 }
 0x2a3   :  { %v4062_v49 = vpop.eup %4061  ;;  %v2505_v52 = vmul.f32 1.442695, %v2501_v46  ;;  %v2532_v0 = vmul.f32 %v2473_v59, %v2473_v59 }
 0x2a4   :  { %v2529_v53 = vmul.f32 %v4062_v49, %v4062_v49  ;;  %v2509_v60 = vmul.f32 %v4062_v49, %v2507_v47 }
 0x2a5   :  { %4063 = vpow2.f32 %v2505_v52 }
 0x2a6   :  { %v2511_v42 = vadd.f32 %v2509_v60, %v2471_v48  ;;  %v2533_v58 = vadd.f32 %v2531_v57, %v2529_v53 }
 0x2a8   :  { %2513 = vst [vmem:[#allocation13] sm:$0xff] %v2511_v42  ;;  %v2535_v63 = vsub.f32 %v2533_v58, %v2499_v38 }
 0x2aa   :  { %v3753_v6 = vadd.f32 -0.5, %v2535_v63 }
 0x2ab   :  { %v4064_v61 = vpop.eup %4063 }
 0x2ac   :  { %v2530_v1 = vmul.f32 %v4064_v61, %v4064_v61  ;;  %v2510_v2 = vmul.f32 %v4064_v61, %v2508_v18  ;;  %v2539_v10 = vsel %vm2524_vm1, %v3753_v6, 0.0 }
 0x2ae   :  { %v2534_v4 = vadd.f32 %v2532_v0, %v2530_v1  ;;  %v2512_v5 = vadd.f32 %v2510_v2, %v2473_v59 }
 0x2b0   :  { %v2536_v9 = vsub.f32 %v2534_v4, %v2501_v46  ;;  %2514 = vst [vmem:[#allocation13 + $0x8] sm:$0xff] %v2512_v5 }
 0x2b1   :  { %2555 = dma.vmem_to_hbm [thread:$0]  %s2548_s22, 256, %s2550_s3, [#allocation4], %s4270_s17, %s4270_s17, %s4271_s18  }
 0x2b2   :  { %v3754_v7 = vadd.f32 -0.5, %v2536_v9 }
 0x2b4   :  { %v2540_v11 = vsel %vm2524_vm1, %v3754_v7, 0.0 }
 0x2b5   :  { %v2541_v43 = vadd.f32 %v2540_v11, %v2539_v10 }
 0x2b7   :  { %2542 = vst [vmem:[#allocation14] sm:$0xff] %v2541_v43 }
 0x2b8   :  { %2566 = dma.vmem_to_hbm [thread:$0]  %s2562_s8, 128, %s2564_s28, [#allocation15]  }
 0x2b9   :  { %4265 = dma.done.wait [#allocation4], 256  }
 0x2ba   :  { %4266 = vsyncadd [#allocation4], 4294967040 }
 0x2bb   :  { %4267 = dma.done.wait [#allocation15], 128  }
 0x2bc   :  { %4268 = vsyncadd [#allocation15], 4294967168 }
 0x2bd   :  { %2575 = vsyncpa [#allocation3], 1 }
 0x2be   :  { %2576 = vsyncpa [#allocation6], 1 }
 0x2bf   :  { %2577 = vsyncpa [#allocation9], 1 }
 0x2c0   :  { %2578 = vsyncpa [#allocation12], 1 }
 0x2c1   :  { %2579 = vsyncpa [#allocation4], 1 }
 0x2c2   :  { %2580 = vsyncpa [#allocation15], 1 }

</bundles_post_ra>
